<compile_context>
chip_gen: v7x
topology: tpu7x:2x2x1
jax: 0.10.0
libtpu: 0.0.40
codegen_flags: <defaults>
</compile_context>

<pallas_src>
import functools

import jax
import jax.numpy as jnp
from jax import lax
from jax.experimental import pallas as pl
from jax.experimental.pallas import tpu as pltpu


def _round_up(x, m):
    return (x + m - 1) // m * m


def _mosaic_params(semantics, vmem_bytes=48 * 1024 * 1024):
    return pltpu.CompilerParams(dimension_semantics=semantics,
                                vmem_limit_bytes=vmem_bytes)


# ---------------------------------------------------------------------------
# Kernel 1 (sequential): fused GRU — chunk-batched input projection + recurrence
# ---------------------------------------------------------------------------
def _gru_recurrence_kernel(t_valid, x_ref, h0_ref, wih_ref, bih_ref, whh_ref, bhh_ref,
                           h_all_ref, h_fin_ref, h_scr, gi_scr):
    """One grid step == one chunk of timesteps.

    x_ref    : (Tc, Bp, Hp)  bf16   embedded tokens (time-major, padded)
    h0_ref   : (Bp, Hp)      f32    initial hidden state
    wih_ref  : (Hp, 3*Hp)    bf16   W_ih^T, per-gate blocks [r|z|n] at offsets k*Hp
    bih_ref  : (1, 3*Hp)     f32
    whh_ref  : (Hp, 3*Hp)    bf16   W_hh^T, same per-gate layout
    bhh_ref  : (1, 3*Hp)     f32
    h_all_ref: (Tc, Bp, Hp)  bf16   hidden state at every timestep (fed to projection)
    h_fin_ref: (Bp, Hp)      f32    final hidden state (written on last chunk only)
    h_scr    : (Bp, Hp)      f32    VMEM scratch carrying h across chunks
    gi_scr   : (Tc, Bp, 3Hp) f32    chunk's input-side gate projections
    """
    c = pl.program_id(0)
    Tc, Bp, Hp = x_ref.shape

    @pl.when(c == 0)
    def _():
        h_scr[...] = h0_ref[...]

    # Chunk-batched input-side gate projection: one big MXU matmul, off the per-timestep
    # serial path (its DMA/compute is hidden by the pipeline).
    x_flat = x_ref[...].reshape(Tc * Bp, Hp)
    gi = jnp.dot(x_flat, wih_ref[...], preferred_element_type=jnp.float32) + bih_ref[...]
    gi_scr[...] = gi.reshape(Tc, Bp, 3 * Hp)

    b_hh = bhh_ref[...]                                        # (1, 3Hp) f32, hoisted

    def step(t, h):
        # ONE fused (Bp,Hp)@(Hp,3Hp) matmul for all three hidden-side gates.
        gh = jnp.dot(h.astype(jnp.bfloat16), whh_ref[...],
                     preferred_element_type=jnp.float32) + b_hh
        gi_t = gi_scr[t]                                       # (Bp, 3Hp)
        # Lane-aligned gate slices (Hp is a multiple of 128). Gate order: [r, z, n].
        r = jax.nn.sigmoid(gi_t[:, :Hp] + gh[:, :Hp])
        z = jax.nn.sigmoid(gi_t[:, Hp:2 * Hp] + gh[:, Hp:2 * Hp])
        n = jnp.tanh(gi_t[:, 2 * Hp:] + r * gh[:, 2 * Hp:])
        h_new = (1.0 - z) * n + z * h
        # Mask timesteps beyond the true sequence length (T padded to a chunk multiple).
        h_new = jnp.where(c * Tc + t < t_valid, h_new, h)
        h_all_ref[t] = h_new.astype(h_all_ref.dtype)
        return h_new

    h_last = lax.fori_loop(0, Tc, step, h_scr[...], unroll=True)
    h_scr[...] = h_last

    @pl.when(c == pl.num_programs(0) - 1)
    def _():
        h_fin_ref[...] = h_last


# ---------------------------------------------------------------------------
# Kernel 2 (rows parallel, vocab tiled): projection + online log-sum-exp
# ---------------------------------------------------------------------------
def _proj_lse_kernel(h_ref, w_ref, b_ref, logits_ref, lse_ref, m_scr, l_scr):
    # h_ref: (Rt, Hp) bf16; w_ref: (Hp, Vt) bf16; b_ref: (1, Vt) f32 (vocab pads = -1e30)
    v = pl.program_id(1)

    @pl.when(v == 0)
    def _():
        m_scr[...] = jnp.full_like(m_scr, -jnp.inf)
        l_scr[...] = jnp.zeros_like(l_scr)

    logits = jnp.dot(h_ref[...], w_ref[...],
                     preferred_element_type=jnp.float32) + b_ref[...]
    logits_ref[...] = logits

    m_prev = m_scr[...]
    m_new = jnp.maximum(m_prev, jnp.max(logits, axis=-1, keepdims=True))
    l_scr[...] = (jnp.exp(m_prev - m_new) * l_scr[...]
                  + jnp.sum(jnp.exp(logits - m_new), axis=-1, keepdims=True))
    m_scr[...] = m_new

    @pl.when(v == pl.num_programs(1) - 1)
    def _():
        lse_ref[...] = m_scr[...] + jnp.log(l_scr[...])


# ---------------------------------------------------------------------------
# Kernel 3 (fully parallel): log-softmax normalization
# ---------------------------------------------------------------------------
def _logsoftmax_normalize_kernel(logits_ref, lse_ref, y_ref):
    y_ref[...] = (logits_ref[...] - lse_ref[...]).astype(y_ref.dtype)


def _pick_t_chunk(T, Bp, Hp, budget_bytes=4 * 1024 * 1024):
    """Size the time chunk by VMEM (x + h_all double-buffered bf16 + f32 gi scratch)."""
    per_t = Bp * (2 * Hp * 2 + 2 * Hp * 2 + 3 * Hp * 4)
    return int(max(1, min(T, 128, budget_bytes // per_t)))


# ---------------------------------------------------------------------------
# Forward pass (DecoderRNN.forward semantics, eval mode)
# ---------------------------------------------------------------------------
def decoder_rnn_forward(params, token_ids, hidden, encoder_outputs, last_hidden, mask):
    """token_ids (B,T) int32; hidden (1,B,H) or None; last_hidden (1,B,H).
    encoder_outputs / mask are unused by this module's forward (API parity).
    Returns (log_probs (B,T,V), hidden (1,B,H), 0)."""
    del encoder_outputs, mask
    if hidden is None:
        hidden = last_hidden

    B, T = token_ids.shape
    H = params["hidden_size"]
    V = params["vocab_size"]
    Hp = params["hp"]
    Vp = params["w_out_t"].shape[1]
    Bp = _round_up(B, 8)

    # Glue: embedding lookup; dropout(p=0.1) is identity in eval mode.
    # TODO(synk): training-mode dropout (p=0.1) not implemented; eval-mode identity used.
    # TODO(synk): embedding gather could be fused into kernel 1 via scalar-prefetched ids
    #             + pl.Element row gather to avoid this wrapper HBM pass.
    emb = jnp.take(params["embedding"], token_ids, axis=0)           # (B, T, Hp) bf16
    x_tbh = jnp.transpose(emb, (1, 0, 2))                            # (T, B, Hp) time-major

    # --- (1) Sequential recurrence, chunked over time (T padded, tail masked). ---
    t_chunk = _pick_t_chunk(T, Bp, Hp)
    Tp = _round_up(T, t_chunk)
    num_chunks = Tp // t_chunk

    x_pad = jnp.pad(x_tbh, ((0, Tp - T), (0, Bp - B), (0, 0)))
    h0 = jnp.pad(hidden[0].astype(jnp.float32), ((0, Bp - B), (0, Hp - H)))

    h_all, h_fin = pl.pallas_call(
        functools.partial(_gru_recurrence_kernel, T),
        out_shape=(jax.ShapeDtypeStruct((Tp, Bp, Hp), jnp.bfloat16),
                   jax.ShapeDtypeStruct((Bp, Hp), jnp.float32)),
        grid_spec=pltpu.PrefetchScalarGridSpec(
            num_scalar_prefetch=0,
            grid=(num_chunks,),
            in_specs=[
                pl.BlockSpec((t_chunk, Bp, Hp), lambda c: (c, 0, 0)),   # x chunk
                pl.BlockSpec((Bp, Hp), lambda c: (0, 0)),               # h0
                pl.BlockSpec((Hp, 3 * Hp), lambda c: (0, 0)),           # W_ih^T
                pl.BlockSpec((1, 3 * Hp), lambda c: (0, 0)),            # b_ih
                pl.BlockSpec((Hp, 3 * Hp), lambda c: (0, 0)),           # W_hh^T
                pl.BlockSpec((1, 3 * Hp), lambda c: (0, 0)),            # b_hh
            ],
            out_specs=[
                pl.BlockSpec((t_chunk, Bp, Hp), lambda c: (c, 0, 0)),   # h_t for all t
                pl.BlockSpec((Bp, Hp), lambda c: (0, 0)),               # final hidden
            ],
            scratch_shapes=[pltpu.VMEM((Bp, Hp), jnp.float32),
                            pltpu.VMEM((t_chunk, Bp, 3 * Hp), jnp.float32)]),
        compiler_params=_mosaic_params(("arbitrary",)),                 # state carried in time
    )(x_pad, h0, params["w_ih_t"], params["b_ih"], params["w_hh_t"], params["b_hh"])

    # --- (2) Projection + online LSE over vocab tiles. ---
    # Transpose the SMALL hidden tensor to batch-major so the big (B,T,V) output needs
    # no transpose afterwards.
    h_bt = jnp.transpose(h_all[:T, :B, :], (1, 0, 2)).reshape(B * T, Hp)

    R = B * T
    row_tile = min(256, _round_up(R, 8))
    Rp = _round_up(R, row_tile)
    vocab_tile = Vp if Vp <= 1024 else 1024        # Vp is a multiple of vocab_tile

    h_rows = jnp.pad(h_bt, ((0, Rp - R), (0, 0)))
    grid = (Rp // row_tile, Vp // vocab_tile)

    logits, lse = pl.pallas_call(
        _proj_lse_kernel,
        out_shape=(jax.ShapeDtypeStruct((Rp, Vp), jnp.float32),
                   jax.ShapeDtypeStruct((Rp, 1), jnp.float32)),
        grid_spec=pltpu.PrefetchScalarGridSpec(
            num_scalar_prefetch=0,
            grid=grid,
            in_specs=[
                pl.BlockSpec((row_tile, Hp), lambda i, v: (i, 0)),
                pl.BlockSpec((Hp, vocab_tile), lambda i, v: (0, v)),
                pl.BlockSpec((1, vocab_tile), lambda i, v: (0, v)),
            ],
            out_specs=[
                pl.BlockSpec((row_tile, vocab_tile), lambda i, v: (i, v)),
                pl.BlockSpec((row_tile, 1), lambda i, v: (i, 0)),
            ],
            scratch_shapes=[pltpu.VMEM((row_tile, 1), jnp.float32),
                            pltpu.VMEM((row_tile, 1), jnp.float32)]),
        compiler_params=_mosaic_params(("parallel", "arbitrary")),
    )(h_rows, params["w_out_t"], params["b_out"])

    # --- (3) Normalize (lane-dense, fully parallel). ---
    log_probs_rows = pl.pallas_call(
        _logsoftmax_normalize_kernel,
        out_shape=jax.ShapeDtypeStruct((Rp, Vp), jnp.float32),
        grid_spec=pltpu.PrefetchScalarGridSpec(
            num_scalar_prefetch=0,
            grid=grid,
            in_specs=[
                pl.BlockSpec((row_tile, vocab_tile), lambda i, v: (i, v)),
                pl.BlockSpec((row_tile, 1), lambda i, v: (i, 0)),
            ],
            out_specs=pl.BlockSpec((row_tile, vocab_tile), lambda i, v: (i, v))),
        compiler_params=_mosaic_params(("parallel", "parallel")),
    )(logits, lse)

    log_probs = log_probs_rows[:R, :V].reshape(B, T, V)                 # already batch-major
    hidden_out = h_fin[:B, :H][None, :, :]
    return log_probs, hidden_out, 0


# ---------------------------------------------------------------------------
# Parameters
# ---------------------------------------------------------------------------
def init_params(key, hidden_size, output_size):
    """PyTorch-layout synthetic parameters (f32, uniform ranges like nn.GRU/Linear)."""
    ks = jax.random.split(key, 7)
    bound = 1.0 / jnp.sqrt(hidden_size)
    u = lambda k, shape, b: jax.random.uniform(k, shape, jnp.float32, -b, b)
    return {
        "embedding": jax.random.normal(ks[0], (output_size, hidden_size), jnp.float32),
        "w_ih": u(ks[1], (3 * hidden_size, hidden_size), bound),   # gate order [r, z, n]
        "w_hh": u(ks[2], (3 * hidden_size, hidden_size), bound),
        "b_ih": u(ks[3], (3 * hidden_size,), bound),
        "b_hh": u(ks[4], (3 * hidden_size,), bound),
        "w_out": u(ks[5], (output_size, hidden_size), bound),
        "b_out": u(ks[6], (output_size,), bound),
    }


def prepare_params(raw, hidden_size, output_size):
    """One-time prep: pad H to a 128 multiple (lane-aligned per-gate blocks), pad the
    vocab axis to a tile multiple (pad bias = -1e30), cast MXU operands to bf16."""
    H, V = hidden_size, output_size
    Hp = _round_up(H, 128)
    vocab_tile = min(1024, _round_up(V, 128))
    Vp = _round_up(V, vocab_tile)

    def split_pad_gates(w):                 # (3H, H) -> (Hp, 3Hp), per-gate blocks [r|z|n]
        w3 = w.reshape(3, H, H).transpose(0, 2, 1)                 # (gate, in, out)
        w3 = jnp.pad(w3, ((0, 0), (0, Hp - H), (0, Hp - H)))
        return w3.transpose(1, 0, 2).reshape(Hp, 3 * Hp)

    def pad_gate_bias(b):                   # (3H,) -> (1, 3Hp)
        return jnp.pad(b.reshape(3, H), ((0, 0), (0, Hp - H))).reshape(1, 3 * Hp)

    w_out_t = jnp.pad(raw["w_out"].T, ((0, Hp - H), (0, Vp - V)))
    b_out = jnp.pad(raw["b_out"].reshape(1, V), ((0, 0), (0, Vp - V)),
                    constant_values=-1e30)

    return {
        "hidden_size": H,
        "vocab_size": V,
        "hp": Hp,
        "embedding": jnp.pad(raw["embedding"],
                             ((0, 0), (0, Hp - H))).astype(jnp.bfloat16),  # (V, Hp)
        "w_ih_t": split_pad_gates(raw["w_ih"]).astype(jnp.bfloat16),       # (Hp, 3Hp)
        "b_ih": pad_gate_bias(raw["b_ih"]).astype(jnp.float32),            # (1, 3Hp)
        "w_hh_t": split_pad_gates(raw["w_hh"]).astype(jnp.bfloat16),       # (Hp, 3Hp)
        "b_hh": pad_gate_bias(raw["b_hh"]).astype(jnp.float32),            # (1, 3Hp)
        "w_out_t": w_out_t.astype(jnp.bfloat16),                           # (Hp, Vp)
        "b_out": b_out.astype(jnp.float32),                                # (1, Vp)
    }


# ---------------------------------------------------------------------------
# Pure-JAX reference (numerics matched to bf16 weights) for correctness check
# ---------------------------------------------------------------------------
def reference_forward(raw, token_ids, hidden, last_hidden, H):
    if hidden is None:
        hidden = last_hidden
    q = lambda a: a.astype(jnp.bfloat16).astype(jnp.float32)
    emb = q(raw["embedding"])[token_ids]                       # (B, T, H)
    w_ih, w_hh = q(raw["w_ih"]), q(raw["w_hh"])
    b_ih, b_hh = raw["b_ih"], raw["b_hh"]
    w_out, b_out = q(raw["w_out"]), raw["b_out"]

    B, T = token_ids.shape
    h = hidden[0].astype(jnp.float32)
    hs = []
    for t in range(T):
        gi = emb[:, t, :] @ w_ih.T + b_ih
        gh = h @ w_hh.T + b_hh
        r = jax.nn.sigmoid(gi[:, :H] + gh[:, :H])
        z = jax.nn.sigmoid(gi[:, H:2 * H] + gh[:, H:2 * H])
        n = jnp.tanh(gi[:, 2 * H:] + r * gh[:, 2 * H:])
        h = (1.0 - z) * n + z * h
        hs.append(h)
    hseq = jnp.stack(hs, axis=1)                               # (B, T, H)
    logits = hseq @ w_out.T + b_out
    return jax.nn.log_softmax(logits, axis=-1), h[None]


if __name__ == "__main__":
    B, T, H, V = 2, 8, 32, 16   # batch, seq, hidden_size, output_size (vocab)

    key = jax.random.PRNGKey(0)
    k_par, k_tok, k_hid = jax.random.split(key, 3)

    raw = init_params(k_par, H, V)
    params = prepare_params(raw, H, V)

    token_ids = jax.random.randint(k_tok, (B, T), 0, V, dtype=jnp.int32)
    last_hidden = jax.random.normal(k_hid, (1, B, H), jnp.float32)
    encoder_outputs = jnp.zeros((B, T, H), jnp.float32)   # unused by forward
    mask = jnp.ones((B, T), jnp.float32)                  # unused by forward

    # hidden=None path -> uses last_hidden, mirroring the PyTorch module.
    log_probs, hidden_out, zero = decoder_rnn_forward(
        params, token_ids, None, encoder_outputs, last_hidden, mask)

    jax.block_until_ready(log_probs)
    jax.block_until_ready(hidden_out)

    assert log_probs.shape == (B, T, V)
    assert hidden_out.shape == (1, B, H)
    assert zero == 0
    # log-softmax sanity: rows sum to 1 in prob space
    assert bool(jnp.allclose(jnp.sum(jnp.exp(log_probs), axis=-1), 1.0, atol=1e-4))

    # Numerical check vs. a pure-JAX GRU/log-softmax reference (bf16-matched weights).
    ref_lp, ref_h = reference_forward(raw, token_ids, None, last_hidden, H)
    assert bool(jnp.allclose(log_probs, ref_lp, atol=5e-2))
    assert bool(jnp.allclose(hidden_out, ref_h, atol=5e-2))

    print("KERNEL_OK")
</pallas_src>

<mosaic_0001>
module attributes {stable_mosaic.version = 11 : i64} {
  func.func @_gru_recurrence_kernel(%arg0: i32, %arg1: memref<8x8x128xbf16, #tpu.memory_space<vmem>>, %arg2: memref<8x128xf32, #tpu.memory_space<vmem>>, %arg3: memref<128x384xbf16, #tpu.memory_space<vmem>>, %arg4: memref<1x384xf32, #tpu.memory_space<vmem>>, %arg5: memref<128x384xbf16, #tpu.memory_space<vmem>>, %arg6: memref<1x384xf32, #tpu.memory_space<vmem>>, %arg7: memref<8x8x128xbf16, #tpu.memory_space<vmem>>, %arg8: memref<8x128xf32, #tpu.memory_space<vmem>>, %arg9: memref<8x128xf32, #tpu.memory_space<vmem>>, %arg10: memref<8x8x384xf32, #tpu.memory_space<vmem>>) attributes {dimension_semantics = [#tpu.dimension_semantics<arbitrary>], iteration_bounds = array<i64: 1>, scalar_prefetch = 0 : i64, scratch_operands = 2 : i64, tpu.core_type = #tpu.core_type<tc>, window_params = [{transform_indices = @transform_0, window_bounds = array<i64: 8, 8, 128>}, {pipeline_mode = #tpu.pipeline_mode<synchronous>, transform_indices = @transform_1, window_bounds = array<i64: 8, 128>}, {pipeline_mode = #tpu.pipeline_mode<synchronous>, transform_indices = @transform_2, window_bounds = array<i64: 128, 384>}, {pipeline_mode = #tpu.pipeline_mode<synchronous>, transform_indices = @transform_3, window_bounds = array<i64: 1, 384>}, {pipeline_mode = #tpu.pipeline_mode<synchronous>, transform_indices = @transform_4, window_bounds = array<i64: 128, 384>}, {pipeline_mode = #tpu.pipeline_mode<synchronous>, transform_indices = @transform_5, window_bounds = array<i64: 1, 384>}, {transform_indices = @transform_6, window_bounds = array<i64: 8, 8, 128>}, {pipeline_mode = #tpu.pipeline_mode<synchronous>, transform_indices = @transform_7, window_bounds = array<i64: 8, 128>}]} {
    %c0_i32 = arith.constant 0 : i32
    %0 = arith.cmpi eq, %arg0, %c0_i32 : i32
    %1 = arith.extui %0 : i1 to i32
    %c0_i32_0 = arith.constant 0 : i32
    %2 = arith.cmpi ne, %1, %c0_i32_0 : i32
    scf.if %2 {
      %c0_115 = arith.constant 0 : index
      %c0_116 = arith.constant 0 : index
      %362 = vector.load %arg2[%c0_115, %c0_116] : memref<8x128xf32, #tpu.memory_space<vmem>>, vector<8x128xf32>
      %c0_117 = arith.constant 0 : index
      %c0_118 = arith.constant 0 : index
      %363 = vector.load %arg9[%c0_117, %c0_118] : memref<8x128xf32, #tpu.memory_space<vmem>>, vector<8x128xf32>
      tpu.vector_store %arg9[%c0_117, %c0_118], %362 {strides = array<i32>} : memref<8x128xf32, #tpu.memory_space<vmem>>, vector<8x128xf32>,
    } else {
    }
    %c0 = arith.constant 0 : index
    %c0_1 = arith.constant 0 : index
    %c0_2 = arith.constant 0 : index
    %3 = vector.load %arg1[%c0, %c0_1, %c0_2] : memref<8x8x128xbf16, #tpu.memory_space<vmem>>, vector<8x8x128xbf16>
    %4 = vector.shape_cast %3 : vector<8x8x128xbf16> to vector<64x128xbf16>
    %c0_3 = arith.constant 0 : index
    %c0_4 = arith.constant 0 : index
    %5 = vector.load %arg3[%c0_3, %c0_4] : memref<128x384xbf16, #tpu.memory_space<vmem>>, vector<128x384xbf16>
    %cst = arith.constant dense<0.000000e+00> : vector<64x384xf32>
    %6 = tpu.matmul %4, %5, %cst {dimension_numbers = #tpu.dot_dimension_numbers<[1], [0], [0], [1], [0, 0, 1, 1], [], []>} : vector<64x128xbf16>, vector<128x384xbf16>, vector<64x384xf32> -> vector<64x384xf32>
    %c0_5 = arith.constant 0 : index
    %c0_6 = arith.constant 0 : index
    %7 = vector.load %arg4[%c0_5, %c0_6] : memref<1x384xf32, #tpu.memory_space<vmem>>, vector<1x384xf32>
    %8 = vector.broadcast %7 : vector<1x384xf32> to vector<64x384xf32>
    %9 = arith.addf %6, %8 : vector<64x384xf32>
    %10 = vector.shape_cast %9 : vector<64x384xf32> to vector<8x8x384xf32>
    %c0_7 = arith.constant 0 : index
    %c0_8 = arith.constant 0 : index
    %c0_9 = arith.constant 0 : index
    %11 = vector.load %arg10[%c0_7, %c0_8, %c0_9] : memref<8x8x384xf32, #tpu.memory_space<vmem>>, vector<8x8x384xf32>
    tpu.vector_store %arg10[%c0_7, %c0_8, %c0_9], %10 {strides = array<i32>} : memref<8x8x384xf32, #tpu.memory_space<vmem>>, vector<8x8x384xf32>,
    %c0_10 = arith.constant 0 : index
    %c0_11 = arith.constant 0 : index
    %12 = vector.load %arg6[%c0_10, %c0_11] : memref<1x384xf32, #tpu.memory_space<vmem>>, vector<1x384xf32>
    %c0_12 = arith.constant 0 : index
    %c0_13 = arith.constant 0 : index
    %13 = vector.load %arg9[%c0_12, %c0_13] : memref<8x128xf32, #tpu.memory_space<vmem>>, vector<8x128xf32>
    %c0_i32_14 = arith.constant 0 : i32
    %14 = arith.truncf %13 : vector<8x128xf32> to vector<8x128xbf16>
    %c0_15 = arith.constant 0 : index
    %c0_16 = arith.constant 0 : index
    %15 = vector.load %arg5[%c0_15, %c0_16] : memref<128x384xbf16, #tpu.memory_space<vmem>>, vector<128x384xbf16>
    %cst_17 = arith.constant dense<0.000000e+00> : vector<8x384xf32>
    %16 = tpu.matmul %14, %15, %cst_17 {dimension_numbers = #tpu.dot_dimension_numbers<[1], [0], [0], [1], [0, 0, 1, 1], [], []>} : vector<8x128xbf16>, vector<128x384xbf16>, vector<8x384xf32> -> vector<8x384xf32>
    %17 = vector.broadcast %12 : vector<1x384xf32> to vector<8x384xf32>
    %18 = arith.addf %16, %17 : vector<8x384xf32>
    %19 = arith.index_cast %c0_i32_14 : i32 to index
    %c0_18 = arith.constant 0 : index
    %c0_19 = arith.constant 0 : index
    %20 = vector.load %arg10[%19, %c0_18, %c0_19] : memref<8x8x384xf32, #tpu.memory_space<vmem>>, vector<1x8x384xf32>
    %21 = vector.shape_cast %20 : vector<1x8x384xf32> to vector<8x384xf32>
    %22 = vector.extract_strided_slice %21 {offsets = [0, 0], sizes = [8, 128], strides = [1, 1]} : vector<8x384xf32> to vector<8x128xf32>
    %23 = vector.extract_strided_slice %18 {offsets = [0, 0], sizes = [8, 128], strides = [1, 1]} : vector<8x384xf32> to vector<8x128xf32>
    %24 = arith.addf %22, %23 : vector<8x128xf32>
    %25 = arith.negf %24 : vector<8x128xf32>
    %26 = math.exp %25 : vector<8x128xf32>
    %cst_20 = arith.constant 1.000000e+00 : f32
    %27 = vector.broadcast %cst_20 : f32 to vector<8x128xf32>
    %28 = arith.addf %27, %26 : vector<8x128xf32>
    %29 = arith.divf %27, %28 : vector<8x128xf32>
    %30 = vector.extract_strided_slice %21 {offsets = [0, 128], sizes = [8, 128], strides = [1, 1]} : vector<8x384xf32> to vector<8x128xf32>
    %31 = vector.extract_strided_slice %18 {offsets = [0, 128], sizes = [8, 128], strides = [1, 1]} : vector<8x384xf32> to vector<8x128xf32>
    %32 = arith.addf %30, %31 : vector<8x128xf32>
    %33 = arith.negf %32 : vector<8x128xf32>
    %34 = math.exp %33 : vector<8x128xf32>
    %cst_21 = arith.constant 1.000000e+00 : f32
    %35 = vector.broadcast %cst_21 : f32 to vector<8x128xf32>
    %36 = arith.addf %35, %34 : vector<8x128xf32>
    %37 = arith.divf %35, %36 : vector<8x128xf32>
    %38 = vector.extract_strided_slice %21 {offsets = [0, 256], sizes = [8, 128], strides = [1, 1]} : vector<8x384xf32> to vector<8x128xf32>
    %39 = vector.extract_strided_slice %18 {offsets = [0, 256], sizes = [8, 128], strides = [1, 1]} : vector<8x384xf32> to vector<8x128xf32>
    %40 = arith.mulf %29, %39 : vector<8x128xf32>
    %41 = arith.addf %38, %40 : vector<8x128xf32>
    %42 = math.tanh %41 : vector<8x128xf32>
    %cst_22 = arith.constant 1.000000e+00 : f32
    %43 = vector.broadcast %cst_22 : f32 to vector<8x128xf32>
    %44 = arith.subf %43, %37 : vector<8x128xf32>
    %45 = arith.mulf %44, %42 : vector<8x128xf32>
    %46 = arith.mulf %37, %13 : vector<8x128xf32>
    %47 = arith.addf %45, %46 : vector<8x128xf32>
    %c8_i32 = arith.constant 8 : i32
    %48 = arith.muli %arg0, %c8_i32 : i32
    %49 = arith.addi %48, %c0_i32_14 : i32
    %c8_i32_23 = arith.constant 8 : i32
    %50 = arith.cmpi slt, %49, %c8_i32_23 : i32
    %51 = arith.select %50, %47, %13 : vector<8x128xf32>
    %52 = arith.truncf %51 : vector<8x128xf32> to vector<8x128xbf16>
    %53 = arith.index_cast %c0_i32_14 : i32 to index
    %c0_24 = arith.constant 0 : index
    %c0_25 = arith.constant 0 : index
    %54 = vector.load %arg7[%53, %c0_24, %c0_25] : memref<8x8x128xbf16, #tpu.memory_space<vmem>>, vector<1x8x128xbf16>
    %55 = vector.shape_cast %54 : vector<1x8x128xbf16> to vector<8x128xbf16>
    %56 = vector.shape_cast %52 : vector<8x128xbf16> to vector<1x8x128xbf16>
    tpu.vector_store %arg7[%53, %c0_24, %c0_25], %56 {strides = array<i32>} : memref<8x8x128xbf16, #tpu.memory_space<vmem>>, vector<1x8x128xbf16>,
    %c1_i32 = arith.constant 1 : i32
    %57 = arith.truncf %51 : vector<8x128xf32> to vector<8x128xbf16>
    %c0_26 = arith.constant 0 : index
    %c0_27 = arith.constant 0 : index
    %58 = vector.load %arg5[%c0_26, %c0_27] : memref<128x384xbf16, #tpu.memory_space<vmem>>, vector<128x384xbf16>
    %cst_28 = arith.constant dense<0.000000e+00> : vector<8x384xf32>
    %59 = tpu.matmul %57, %58, %cst_28 {dimension_numbers = #tpu.dot_dimension_numbers<[1], [0], [0], [1], [0, 0, 1, 1], [], []>} : vector<8x128xbf16>, vector<128x384xbf16>, vector<8x384xf32> -> vector<8x384xf32>
    %60 = vector.broadcast %12 : vector<1x384xf32> to vector<8x384xf32>
    %61 = arith.addf %59, %60 : vector<8x384xf32>
    %62 = arith.index_cast %c1_i32 : i32 to index
    %c0_29 = arith.constant 0 : index
    %c0_30 = arith.constant 0 : index
    %63 = vector.load %arg10[%62, %c0_29, %c0_30] : memref<8x8x384xf32, #tpu.memory_space<vmem>>, vector<1x8x384xf32>
    %64 = vector.shape_cast %63 : vector<1x8x384xf32> to vector<8x384xf32>
    %65 = vector.extract_strided_slice %64 {offsets = [0, 0], sizes = [8, 128], strides = [1, 1]} : vector<8x384xf32> to vector<8x128xf32>
    %66 = vector.extract_strided_slice %61 {offsets = [0, 0], sizes = [8, 128], strides = [1, 1]} : vector<8x384xf32> to vector<8x128xf32>
    %67 = arith.addf %65, %66 : vector<8x128xf32>
    %68 = arith.negf %67 : vector<8x128xf32>
    %69 = math.exp %68 : vector<8x128xf32>
    %cst_31 = arith.constant 1.000000e+00 : f32
    %70 = vector.broadcast %cst_31 : f32 to vector<8x128xf32>
    %71 = arith.addf %70, %69 : vector<8x128xf32>
    %72 = arith.divf %70, %71 : vector<8x128xf32>
    %73 = vector.extract_strided_slice %64 {offsets = [0, 128], sizes = [8, 128], strides = [1, 1]} : vector<8x384xf32> to vector<8x128xf32>
    %74 = vector.extract_strided_slice %61 {offsets = [0, 128], sizes = [8, 128], strides = [1, 1]} : vector<8x384xf32> to vector<8x128xf32>
    %75 = arith.addf %73, %74 : vector<8x128xf32>
    %76 = arith.negf %75 : vector<8x128xf32>
    %77 = math.exp %76 : vector<8x128xf32>
    %cst_32 = arith.constant 1.000000e+00 : f32
    %78 = vector.broadcast %cst_32 : f32 to vector<8x128xf32>
    %79 = arith.addf %78, %77 : vector<8x128xf32>
    %80 = arith.divf %78, %79 : vector<8x128xf32>
    %81 = vector.extract_strided_slice %64 {offsets = [0, 256], sizes = [8, 128], strides = [1, 1]} : vector<8x384xf32> to vector<8x128xf32>
    %82 = vector.extract_strided_slice %61 {offsets = [0, 256], sizes = [8, 128], strides = [1, 1]} : vector<8x384xf32> to vector<8x128xf32>
    %83 = arith.mulf %72, %82 : vector<8x128xf32>
    %84 = arith.addf %81, %83 : vector<8x128xf32>
    %85 = math.tanh %84 : vector<8x128xf32>
    %cst_33 = arith.constant 1.000000e+00 : f32
    %86 = vector.broadcast %cst_33 : f32 to vector<8x128xf32>
    %87 = arith.subf %86, %80 : vector<8x128xf32>
    %88 = arith.mulf %87, %85 : vector<8x128xf32>
    %89 = arith.mulf %80, %51 : vector<8x128xf32>
    %90 = arith.addf %88, %89 : vector<8x128xf32>
    %c8_i32_34 = arith.constant 8 : i32
    %91 = arith.muli %arg0, %c8_i32_34 : i32
    %92 = arith.addi %91, %c1_i32 : i32
    %c8_i32_35 = arith.constant 8 : i32
    %93 = arith.cmpi slt, %92, %c8_i32_35 : i32
    %94 = arith.select %93, %90, %51 : vector<8x128xf32>
    %95 = arith.truncf %94 : vector<8x128xf32> to vector<8x128xbf16>
    %96 = arith.index_cast %c1_i32 : i32 to index
    %c0_36 = arith.constant 0 : index
    %c0_37 = arith.constant 0 : index
    %97 = vector.load %arg7[%96, %c0_36, %c0_37] : memref<8x8x128xbf16, #tpu.memory_space<vmem>>, vector<1x8x128xbf16>
    %98 = vector.shape_cast %97 : vector<1x8x128xbf16> to vector<8x128xbf16>
    %99 = vector.shape_cast %95 : vector<8x128xbf16> to vector<1x8x128xbf16>
    tpu.vector_store %arg7[%96, %c0_36, %c0_37], %99 {strides = array<i32>} : memref<8x8x128xbf16, #tpu.memory_space<vmem>>, vector<1x8x128xbf16>,
    %c2_i32 = arith.constant 2 : i32
    %100 = arith.truncf %94 : vector<8x128xf32> to vector<8x128xbf16>
    %c0_38 = arith.constant 0 : index
    %c0_39 = arith.constant 0 : index
    %101 = vector.load %arg5[%c0_38, %c0_39] : memref<128x384xbf16, #tpu.memory_space<vmem>>, vector<128x384xbf16>
    %cst_40 = arith.constant dense<0.000000e+00> : vector<8x384xf32>
    %102 = tpu.matmul %100, %101, %cst_40 {dimension_numbers = #tpu.dot_dimension_numbers<[1], [0], [0], [1], [0, 0, 1, 1], [], []>} : vector<8x128xbf16>, vector<128x384xbf16>, vector<8x384xf32> -> vector<8x384xf32>
    %103 = vector.broadcast %12 : vector<1x384xf32> to vector<8x384xf32>
    %104 = arith.addf %102, %103 : vector<8x384xf32>
    %105 = arith.index_cast %c2_i32 : i32 to index
    %c0_41 = arith.constant 0 : index
    %c0_42 = arith.constant 0 : index
    %106 = vector.load %arg10[%105, %c0_41, %c0_42] : memref<8x8x384xf32, #tpu.memory_space<vmem>>, vector<1x8x384xf32>
    %107 = vector.shape_cast %106 : vector<1x8x384xf32> to vector<8x384xf32>
    %108 = vector.extract_strided_slice %107 {offsets = [0, 0], sizes = [8, 128], strides = [1, 1]} : vector<8x384xf32> to vector<8x128xf32>
    %109 = vector.extract_strided_slice %104 {offsets = [0, 0], sizes = [8, 128], strides = [1, 1]} : vector<8x384xf32> to vector<8x128xf32>
    %110 = arith.addf %108, %109 : vector<8x128xf32>
    %111 = arith.negf %110 : vector<8x128xf32>
    %112 = math.exp %111 : vector<8x128xf32>
    %cst_43 = arith.constant 1.000000e+00 : f32
    %113 = vector.broadcast %cst_43 : f32 to vector<8x128xf32>
    %114 = arith.addf %113, %112 : vector<8x128xf32>
    %115 = arith.divf %113, %114 : vector<8x128xf32>
    %116 = vector.extract_strided_slice %107 {offsets = [0, 128], sizes = [8, 128], strides = [1, 1]} : vector<8x384xf32> to vector<8x128xf32>
    %117 = vector.extract_strided_slice %104 {offsets = [0, 128], sizes = [8, 128], strides = [1, 1]} : vector<8x384xf32> to vector<8x128xf32>
    %118 = arith.addf %116, %117 : vector<8x128xf32>
    %119 = arith.negf %118 : vector<8x128xf32>
    %120 = math.exp %119 : vector<8x128xf32>
    %cst_44 = arith.constant 1.000000e+00 : f32
    %121 = vector.broadcast %cst_44 : f32 to vector<8x128xf32>
    %122 = arith.addf %121, %120 : vector<8x128xf32>
    %123 = arith.divf %121, %122 : vector<8x128xf32>
    %124 = vector.extract_strided_slice %107 {offsets = [0, 256], sizes = [8, 128], strides = [1, 1]} : vector<8x384xf32> to vector<8x128xf32>
    %125 = vector.extract_strided_slice %104 {offsets = [0, 256], sizes = [8, 128], strides = [1, 1]} : vector<8x384xf32> to vector<8x128xf32>
    %126 = arith.mulf %115, %125 : vector<8x128xf32>
    %127 = arith.addf %124, %126 : vector<8x128xf32>
    %128 = math.tanh %127 : vector<8x128xf32>
    %cst_45 = arith.constant 1.000000e+00 : f32
    %129 = vector.broadcast %cst_45 : f32 to vector<8x128xf32>
    %130 = arith.subf %129, %123 : vector<8x128xf32>
    %131 = arith.mulf %130, %128 : vector<8x128xf32>
    %132 = arith.mulf %123, %94 : vector<8x128xf32>
    %133 = arith.addf %131, %132 : vector<8x128xf32>
    %c8_i32_46 = arith.constant 8 : i32
    %134 = arith.muli %arg0, %c8_i32_46 : i32
    %135 = arith.addi %134, %c2_i32 : i32
    %c8_i32_47 = arith.constant 8 : i32
    %136 = arith.cmpi slt, %135, %c8_i32_47 : i32
    %137 = arith.select %136, %133, %94 : vector<8x128xf32>
    %138 = arith.truncf %137 : vector<8x128xf32> to vector<8x128xbf16>
    %139 = arith.index_cast %c2_i32 : i32 to index
    %c0_48 = arith.constant 0 : index
    %c0_49 = arith.constant 0 : index
    %140 = vector.load %arg7[%139, %c0_48, %c0_49] : memref<8x8x128xbf16, #tpu.memory_space<vmem>>, vector<1x8x128xbf16>
    %141 = vector.shape_cast %140 : vector<1x8x128xbf16> to vector<8x128xbf16>
    %142 = vector.shape_cast %138 : vector<8x128xbf16> to vector<1x8x128xbf16>
    tpu.vector_store %arg7[%139, %c0_48, %c0_49], %142 {strides = array<i32>} : memref<8x8x128xbf16, #tpu.memory_space<vmem>>, vector<1x8x128xbf16>,
    %c3_i32 = arith.constant 3 : i32
    %143 = arith.truncf %137 : vector<8x128xf32> to vector<8x128xbf16>
    %c0_50 = arith.constant 0 : index
    %c0_51 = arith.constant 0 : index
    %144 = vector.load %arg5[%c0_50, %c0_51] : memref<128x384xbf16, #tpu.memory_space<vmem>>, vector<128x384xbf16>
    %cst_52 = arith.constant dense<0.000000e+00> : vector<8x384xf32>
    %145 = tpu.matmul %143, %144, %cst_52 {dimension_numbers = #tpu.dot_dimension_numbers<[1], [0], [0], [1], [0, 0, 1, 1], [], []>} : vector<8x128xbf16>, vector<128x384xbf16>, vector<8x384xf32> -> vector<8x384xf32>
    %146 = vector.broadcast %12 : vector<1x384xf32> to vector<8x384xf32>
    %147 = arith.addf %145, %146 : vector<8x384xf32>
    %148 = arith.index_cast %c3_i32 : i32 to index
    %c0_53 = arith.constant 0 : index
    %c0_54 = arith.constant 0 : index
    %149 = vector.load %arg10[%148, %c0_53, %c0_54] : memref<8x8x384xf32, #tpu.memory_space<vmem>>, vector<1x8x384xf32>
    %150 = vector.shape_cast %149 : vector<1x8x384xf32> to vector<8x384xf32>
    %151 = vector.extract_strided_slice %150 {offsets = [0, 0], sizes = [8, 128], strides = [1, 1]} : vector<8x384xf32> to vector<8x128xf32>
    %152 = vector.extract_strided_slice %147 {offsets = [0, 0], sizes = [8, 128], strides = [1, 1]} : vector<8x384xf32> to vector<8x128xf32>
    %153 = arith.addf %151, %152 : vector<8x128xf32>
    %154 = arith.negf %153 : vector<8x128xf32>
    %155 = math.exp %154 : vector<8x128xf32>
    %cst_55 = arith.constant 1.000000e+00 : f32
    %156 = vector.broadcast %cst_55 : f32 to vector<8x128xf32>
    %157 = arith.addf %156, %155 : vector<8x128xf32>
    %158 = arith.divf %156, %157 : vector<8x128xf32>
    %159 = vector.extract_strided_slice %150 {offsets = [0, 128], sizes = [8, 128], strides = [1, 1]} : vector<8x384xf32> to vector<8x128xf32>
    %160 = vector.extract_strided_slice %147 {offsets = [0, 128], sizes = [8, 128], strides = [1, 1]} : vector<8x384xf32> to vector<8x128xf32>
    %161 = arith.addf %159, %160 : vector<8x128xf32>
    %162 = arith.negf %161 : vector<8x128xf32>
    %163 = math.exp %162 : vector<8x128xf32>
    %cst_56 = arith.constant 1.000000e+00 : f32
    %164 = vector.broadcast %cst_56 : f32 to vector<8x128xf32>
    %165 = arith.addf %164, %163 : vector<8x128xf32>
    %166 = arith.divf %164, %165 : vector<8x128xf32>
    %167 = vector.extract_strided_slice %150 {offsets = [0, 256], sizes = [8, 128], strides = [1, 1]} : vector<8x384xf32> to vector<8x128xf32>
    %168 = vector.extract_strided_slice %147 {offsets = [0, 256], sizes = [8, 128], strides = [1, 1]} : vector<8x384xf32> to vector<8x128xf32>
    %169 = arith.mulf %158, %168 : vector<8x128xf32>
    %170 = arith.addf %167, %169 : vector<8x128xf32>
    %171 = math.tanh %170 : vector<8x128xf32>
    %cst_57 = arith.constant 1.000000e+00 : f32
    %172 = vector.broadcast %cst_57 : f32 to vector<8x128xf32>
    %173 = arith.subf %172, %166 : vector<8x128xf32>
    %174 = arith.mulf %173, %171 : vector<8x128xf32>
    %175 = arith.mulf %166, %137 : vector<8x128xf32>
    %176 = arith.addf %174, %175 : vector<8x128xf32>
    %c8_i32_58 = arith.constant 8 : i32
    %177 = arith.muli %arg0, %c8_i32_58 : i32
    %178 = arith.addi %177, %c3_i32 : i32
    %c8_i32_59 = arith.constant 8 : i32
    %179 = arith.cmpi slt, %178, %c8_i32_59 : i32
    %180 = arith.select %179, %176, %137 : vector<8x128xf32>
    %181 = arith.truncf %180 : vector<8x128xf32> to vector<8x128xbf16>
    %182 = arith.index_cast %c3_i32 : i32 to index
    %c0_60 = arith.constant 0 : index
    %c0_61 = arith.constant 0 : index
    %183 = vector.load %arg7[%182, %c0_60, %c0_61] : memref<8x8x128xbf16, #tpu.memory_space<vmem>>, vector<1x8x128xbf16>
    %184 = vector.shape_cast %183 : vector<1x8x128xbf16> to vector<8x128xbf16>
    %185 = vector.shape_cast %181 : vector<8x128xbf16> to vector<1x8x128xbf16>
    tpu.vector_store %arg7[%182, %c0_60, %c0_61], %185 {strides = array<i32>} : memref<8x8x128xbf16, #tpu.memory_space<vmem>>, vector<1x8x128xbf16>,
    %c4_i32 = arith.constant 4 : i32
    %186 = arith.truncf %180 : vector<8x128xf32> to vector<8x128xbf16>
    %c0_62 = arith.constant 0 : index
    %c0_63 = arith.constant 0 : index
    %187 = vector.load %arg5[%c0_62, %c0_63] : memref<128x384xbf16, #tpu.memory_space<vmem>>, vector<128x384xbf16>
    %cst_64 = arith.constant dense<0.000000e+00> : vector<8x384xf32>
    %188 = tpu.matmul %186, %187, %cst_64 {dimension_numbers = #tpu.dot_dimension_numbers<[1], [0], [0], [1], [0, 0, 1, 1], [], []>} : vector<8x128xbf16>, vector<128x384xbf16>, vector<8x384xf32> -> vector<8x384xf32>
    %189 = vector.broadcast %12 : vector<1x384xf32> to vector<8x384xf32>
    %190 = arith.addf %188, %189 : vector<8x384xf32>
    %191 = arith.index_cast %c4_i32 : i32 to index
    %c0_65 = arith.constant 0 : index
    %c0_66 = arith.constant 0 : index
    %192 = vector.load %arg10[%191, %c0_65, %c0_66] : memref<8x8x384xf32, #tpu.memory_space<vmem>>, vector<1x8x384xf32>
    %193 = vector.shape_cast %192 : vector<1x8x384xf32> to vector<8x384xf32>
    %194 = vector.extract_strided_slice %193 {offsets = [0, 0], sizes = [8, 128], strides = [1, 1]} : vector<8x384xf32> to vector<8x128xf32>
    %195 = vector.extract_strided_slice %190 {offsets = [0, 0], sizes = [8, 128], strides = [1, 1]} : vector<8x384xf32> to vector<8x128xf32>
    %196 = arith.addf %194, %195 : vector<8x128xf32>
    %197 = arith.negf %196 : vector<8x128xf32>
    %198 = math.exp %197 : vector<8x128xf32>
    %cst_67 = arith.constant 1.000000e+00 : f32
    %199 = vector.broadcast %cst_67 : f32 to vector<8x128xf32>
    %200 = arith.addf %199, %198 : vector<8x128xf32>
    %201 = arith.divf %199, %200 : vector<8x128xf32>
    %202 = vector.extract_strided_slice %193 {offsets = [0, 128], sizes = [8, 128], strides = [1, 1]} : vector<8x384xf32> to vector<8x128xf32>
    %203 = vector.extract_strided_slice %190 {offsets = [0, 128], sizes = [8, 128], strides = [1, 1]} : vector<8x384xf32> to vector<8x128xf32>
    %204 = arith.addf %202, %203 : vector<8x128xf32>
    %205 = arith.negf %204 : vector<8x128xf32>
    %206 = math.exp %205 : vector<8x128xf32>
    %cst_68 = arith.constant 1.000000e+00 : f32
    %207 = vector.broadcast %cst_68 : f32 to vector<8x128xf32>
    %208 = arith.addf %207, %206 : vector<8x128xf32>
    %209 = arith.divf %207, %208 : vector<8x128xf32>
    %210 = vector.extract_strided_slice %193 {offsets = [0, 256], sizes = [8, 128], strides = [1, 1]} : vector<8x384xf32> to vector<8x128xf32>
    %211 = vector.extract_strided_slice %190 {offsets = [0, 256], sizes = [8, 128], strides = [1, 1]} : vector<8x384xf32> to vector<8x128xf32>
    %212 = arith.mulf %201, %211 : vector<8x128xf32>
    %213 = arith.addf %210, %212 : vector<8x128xf32>
    %214 = math.tanh %213 : vector<8x128xf32>
    %cst_69 = arith.constant 1.000000e+00 : f32
    %215 = vector.broadcast %cst_69 : f32 to vector<8x128xf32>
    %216 = arith.subf %215, %209 : vector<8x128xf32>
    %217 = arith.mulf %216, %214 : vector<8x128xf32>
    %218 = arith.mulf %209, %180 : vector<8x128xf32>
    %219 = arith.addf %217, %218 : vector<8x128xf32>
    %c8_i32_70 = arith.constant 8 : i32
    %220 = arith.muli %arg0, %c8_i32_70 : i32
    %221 = arith.addi %220, %c4_i32 : i32
    %c8_i32_71 = arith.constant 8 : i32
    %222 = arith.cmpi slt, %221, %c8_i32_71 : i32
    %223 = arith.select %222, %219, %180 : vector<8x128xf32>
    %224 = arith.truncf %223 : vector<8x128xf32> to vector<8x128xbf16>
    %225 = arith.index_cast %c4_i32 : i32 to index
    %c0_72 = arith.constant 0 : index
    %c0_73 = arith.constant 0 : index
    %226 = vector.load %arg7[%225, %c0_72, %c0_73] : memref<8x8x128xbf16, #tpu.memory_space<vmem>>, vector<1x8x128xbf16>
    %227 = vector.shape_cast %226 : vector<1x8x128xbf16> to vector<8x128xbf16>
    %228 = vector.shape_cast %224 : vector<8x128xbf16> to vector<1x8x128xbf16>
    tpu.vector_store %arg7[%225, %c0_72, %c0_73], %228 {strides = array<i32>} : memref<8x8x128xbf16, #tpu.memory_space<vmem>>, vector<1x8x128xbf16>,
    %c5_i32 = arith.constant 5 : i32
    %229 = arith.truncf %223 : vector<8x128xf32> to vector<8x128xbf16>
    %c0_74 = arith.constant 0 : index
    %c0_75 = arith.constant 0 : index
    %230 = vector.load %arg5[%c0_74, %c0_75] : memref<128x384xbf16, #tpu.memory_space<vmem>>, vector<128x384xbf16>
    %cst_76 = arith.constant dense<0.000000e+00> : vector<8x384xf32>
    %231 = tpu.matmul %229, %230, %cst_76 {dimension_numbers = #tpu.dot_dimension_numbers<[1], [0], [0], [1], [0, 0, 1, 1], [], []>} : vector<8x128xbf16>, vector<128x384xbf16>, vector<8x384xf32> -> vector<8x384xf32>
    %232 = vector.broadcast %12 : vector<1x384xf32> to vector<8x384xf32>
    %233 = arith.addf %231, %232 : vector<8x384xf32>
    %234 = arith.index_cast %c5_i32 : i32 to index
    %c0_77 = arith.constant 0 : index
    %c0_78 = arith.constant 0 : index
    %235 = vector.load %arg10[%234, %c0_77, %c0_78] : memref<8x8x384xf32, #tpu.memory_space<vmem>>, vector<1x8x384xf32>
    %236 = vector.shape_cast %235 : vector<1x8x384xf32> to vector<8x384xf32>
    %237 = vector.extract_strided_slice %236 {offsets = [0, 0], sizes = [8, 128], strides = [1, 1]} : vector<8x384xf32> to vector<8x128xf32>
    %238 = vector.extract_strided_slice %233 {offsets = [0, 0], sizes = [8, 128], strides = [1, 1]} : vector<8x384xf32> to vector<8x128xf32>
    %239 = arith.addf %237, %238 : vector<8x128xf32>
    %240 = arith.negf %239 : vector<8x128xf32>
    %241 = math.exp %240 : vector<8x128xf32>
    %cst_79 = arith.constant 1.000000e+00 : f32
    %242 = vector.broadcast %cst_79 : f32 to vector<8x128xf32>
    %243 = arith.addf %242, %241 : vector<8x128xf32>
    %244 = arith.divf %242, %243 : vector<8x128xf32>
    %245 = vector.extract_strided_slice %236 {offsets = [0, 128], sizes = [8, 128], strides = [1, 1]} : vector<8x384xf32> to vector<8x128xf32>
    %246 = vector.extract_strided_slice %233 {offsets = [0, 128], sizes = [8, 128], strides = [1, 1]} : vector<8x384xf32> to vector<8x128xf32>
    %247 = arith.addf %245, %246 : vector<8x128xf32>
    %248 = arith.negf %247 : vector<8x128xf32>
    %249 = math.exp %248 : vector<8x128xf32>
    %cst_80 = arith.constant 1.000000e+00 : f32
    %250 = vector.broadcast %cst_80 : f32 to vector<8x128xf32>
    %251 = arith.addf %250, %249 : vector<8x128xf32>
    %252 = arith.divf %250, %251 : vector<8x128xf32>
    %253 = vector.extract_strided_slice %236 {offsets = [0, 256], sizes = [8, 128], strides = [1, 1]} : vector<8x384xf32> to vector<8x128xf32>
    %254 = vector.extract_strided_slice %233 {offsets = [0, 256], sizes = [8, 128], strides = [1, 1]} : vector<8x384xf32> to vector<8x128xf32>
    %255 = arith.mulf %244, %254 : vector<8x128xf32>
    %256 = arith.addf %253, %255 : vector<8x128xf32>
    %257 = math.tanh %256 : vector<8x128xf32>
    %cst_81 = arith.constant 1.000000e+00 : f32
    %258 = vector.broadcast %cst_81 : f32 to vector<8x128xf32>
    %259 = arith.subf %258, %252 : vector<8x128xf32>
    %260 = arith.mulf %259, %257 : vector<8x128xf32>
    %261 = arith.mulf %252, %223 : vector<8x128xf32>
    %262 = arith.addf %260, %261 : vector<8x128xf32>
    %c8_i32_82 = arith.constant 8 : i32
    %263 = arith.muli %arg0, %c8_i32_82 : i32
    %264 = arith.addi %263, %c5_i32 : i32
    %c8_i32_83 = arith.constant 8 : i32
    %265 = arith.cmpi slt, %264, %c8_i32_83 : i32
    %266 = arith.select %265, %262, %223 : vector<8x128xf32>
    %267 = arith.truncf %266 : vector<8x128xf32> to vector<8x128xbf16>
    %268 = arith.index_cast %c5_i32 : i32 to index
    %c0_84 = arith.constant 0 : index
    %c0_85 = arith.constant 0 : index
    %269 = vector.load %arg7[%268, %c0_84, %c0_85] : memref<8x8x128xbf16, #tpu.memory_space<vmem>>, vector<1x8x128xbf16>
    %270 = vector.shape_cast %269 : vector<1x8x128xbf16> to vector<8x128xbf16>
    %271 = vector.shape_cast %267 : vector<8x128xbf16> to vector<1x8x128xbf16>
    tpu.vector_store %arg7[%268, %c0_84, %c0_85], %271 {strides = array<i32>} : memref<8x8x128xbf16, #tpu.memory_space<vmem>>, vector<1x8x128xbf16>,
    %c6_i32 = arith.constant 6 : i32
    %272 = arith.truncf %266 : vector<8x128xf32> to vector<8x128xbf16>
    %c0_86 = arith.constant 0 : index
    %c0_87 = arith.constant 0 : index
    %273 = vector.load %arg5[%c0_86, %c0_87] : memref<128x384xbf16, #tpu.memory_space<vmem>>, vector<128x384xbf16>
    %cst_88 = arith.constant dense<0.000000e+00> : vector<8x384xf32>
    %274 = tpu.matmul %272, %273, %cst_88 {dimension_numbers = #tpu.dot_dimension_numbers<[1], [0], [0], [1], [0, 0, 1, 1], [], []>} : vector<8x128xbf16>, vector<128x384xbf16>, vector<8x384xf32> -> vector<8x384xf32>
    %275 = vector.broadcast %12 : vector<1x384xf32> to vector<8x384xf32>
    %276 = arith.addf %274, %275 : vector<8x384xf32>
    %277 = arith.index_cast %c6_i32 : i32 to index
    %c0_89 = arith.constant 0 : index
    %c0_90 = arith.constant 0 : index
    %278 = vector.load %arg10[%277, %c0_89, %c0_90] : memref<8x8x384xf32, #tpu.memory_space<vmem>>, vector<1x8x384xf32>
    %279 = vector.shape_cast %278 : vector<1x8x384xf32> to vector<8x384xf32>
    %280 = vector.extract_strided_slice %279 {offsets = [0, 0], sizes = [8, 128], strides = [1, 1]} : vector<8x384xf32> to vector<8x128xf32>
    %281 = vector.extract_strided_slice %276 {offsets = [0, 0], sizes = [8, 128], strides = [1, 1]} : vector<8x384xf32> to vector<8x128xf32>
    %282 = arith.addf %280, %281 : vector<8x128xf32>
    %283 = arith.negf %282 : vector<8x128xf32>
    %284 = math.exp %283 : vector<8x128xf32>
    %cst_91 = arith.constant 1.000000e+00 : f32
    %285 = vector.broadcast %cst_91 : f32 to vector<8x128xf32>
    %286 = arith.addf %285, %284 : vector<8x128xf32>
    %287 = arith.divf %285, %286 : vector<8x128xf32>
    %288 = vector.extract_strided_slice %279 {offsets = [0, 128], sizes = [8, 128], strides = [1, 1]} : vector<8x384xf32> to vector<8x128xf32>
    %289 = vector.extract_strided_slice %276 {offsets = [0, 128], sizes = [8, 128], strides = [1, 1]} : vector<8x384xf32> to vector<8x128xf32>
    %290 = arith.addf %288, %289 : vector<8x128xf32>
    %291 = arith.negf %290 : vector<8x128xf32>
    %292 = math.exp %291 : vector<8x128xf32>
    %cst_92 = arith.constant 1.000000e+00 : f32
    %293 = vector.broadcast %cst_92 : f32 to vector<8x128xf32>
    %294 = arith.addf %293, %292 : vector<8x128xf32>
    %295 = arith.divf %293, %294 : vector<8x128xf32>
    %296 = vector.extract_strided_slice %279 {offsets = [0, 256], sizes = [8, 128], strides = [1, 1]} : vector<8x384xf32> to vector<8x128xf32>
    %297 = vector.extract_strided_slice %276 {offsets = [0, 256], sizes = [8, 128], strides = [1, 1]} : vector<8x384xf32> to vector<8x128xf32>
    %298 = arith.mulf %287, %297 : vector<8x128xf32>
    %299 = arith.addf %296, %298 : vector<8x128xf32>
    %300 = math.tanh %299 : vector<8x128xf32>
    %cst_93 = arith.constant 1.000000e+00 : f32
    %301 = vector.broadcast %cst_93 : f32 to vector<8x128xf32>
    %302 = arith.subf %301, %295 : vector<8x128xf32>
    %303 = arith.mulf %302, %300 : vector<8x128xf32>
    %304 = arith.mulf %295, %266 : vector<8x128xf32>
    %305 = arith.addf %303, %304 : vector<8x128xf32>
    %c8_i32_94 = arith.constant 8 : i32
    %306 = arith.muli %arg0, %c8_i32_94 : i32
    %307 = arith.addi %306, %c6_i32 : i32
    %c8_i32_95 = arith.constant 8 : i32
    %308 = arith.cmpi slt, %307, %c8_i32_95 : i32
    %309 = arith.select %308, %305, %266 : vector<8x128xf32>
    %310 = arith.truncf %309 : vector<8x128xf32> to vector<8x128xbf16>
    %311 = arith.index_cast %c6_i32 : i32 to index
    %c0_96 = arith.constant 0 : index
    %c0_97 = arith.constant 0 : index
    %312 = vector.load %arg7[%311, %c0_96, %c0_97] : memref<8x8x128xbf16, #tpu.memory_space<vmem>>, vector<1x8x128xbf16>
    %313 = vector.shape_cast %312 : vector<1x8x128xbf16> to vector<8x128xbf16>
    %314 = vector.shape_cast %310 : vector<8x128xbf16> to vector<1x8x128xbf16>
    tpu.vector_store %arg7[%311, %c0_96, %c0_97], %314 {strides = array<i32>} : memref<8x8x128xbf16, #tpu.memory_space<vmem>>, vector<1x8x128xbf16>,
    %c7_i32 = arith.constant 7 : i32
    %315 = arith.truncf %309 : vector<8x128xf32> to vector<8x128xbf16>
    %c0_98 = arith.constant 0 : index
    %c0_99 = arith.constant 0 : index
    %316 = vector.load %arg5[%c0_98, %c0_99] : memref<128x384xbf16, #tpu.memory_space<vmem>>, vector<128x384xbf16>
    %cst_100 = arith.constant dense<0.000000e+00> : vector<8x384xf32>
    %317 = tpu.matmul %315, %316, %cst_100 {dimension_numbers = #tpu.dot_dimension_numbers<[1], [0], [0], [1], [0, 0, 1, 1], [], []>} : vector<8x128xbf16>, vector<128x384xbf16>, vector<8x384xf32> -> vector<8x384xf32>
    %318 = vector.broadcast %12 : vector<1x384xf32> to vector<8x384xf32>
    %319 = arith.addf %317, %318 : vector<8x384xf32>
    %320 = arith.index_cast %c7_i32 : i32 to index
    %c0_101 = arith.constant 0 : index
    %c0_102 = arith.constant 0 : index
    %321 = vector.load %arg10[%320, %c0_101, %c0_102] : memref<8x8x384xf32, #tpu.memory_space<vmem>>, vector<1x8x384xf32>
    %322 = vector.shape_cast %321 : vector<1x8x384xf32> to vector<8x384xf32>
    %323 = vector.extract_strided_slice %322 {offsets = [0, 0], sizes = [8, 128], strides = [1, 1]} : vector<8x384xf32> to vector<8x128xf32>
    %324 = vector.extract_strided_slice %319 {offsets = [0, 0], sizes = [8, 128], strides = [1, 1]} : vector<8x384xf32> to vector<8x128xf32>
    %325 = arith.addf %323, %324 : vector<8x128xf32>
    %326 = arith.negf %325 : vector<8x128xf32>
    %327 = math.exp %326 : vector<8x128xf32>
    %cst_103 = arith.constant 1.000000e+00 : f32
    %328 = vector.broadcast %cst_103 : f32 to vector<8x128xf32>
    %329 = arith.addf %328, %327 : vector<8x128xf32>
    %330 = arith.divf %328, %329 : vector<8x128xf32>
    %331 = vector.extract_strided_slice %322 {offsets = [0, 128], sizes = [8, 128], strides = [1, 1]} : vector<8x384xf32> to vector<8x128xf32>
    %332 = vector.extract_strided_slice %319 {offsets = [0, 128], sizes = [8, 128], strides = [1, 1]} : vector<8x384xf32> to vector<8x128xf32>
    %333 = arith.addf %331, %332 : vector<8x128xf32>
    %334 = arith.negf %333 : vector<8x128xf32>
    %335 = math.exp %334 : vector<8x128xf32>
    %cst_104 = arith.constant 1.000000e+00 : f32
    %336 = vector.broadcast %cst_104 : f32 to vector<8x128xf32>
    %337 = arith.addf %336, %335 : vector<8x128xf32>
    %338 = arith.divf %336, %337 : vector<8x128xf32>
    %339 = vector.extract_strided_slice %322 {offsets = [0, 256], sizes = [8, 128], strides = [1, 1]} : vector<8x384xf32> to vector<8x128xf32>
    %340 = vector.extract_strided_slice %319 {offsets = [0, 256], sizes = [8, 128], strides = [1, 1]} : vector<8x384xf32> to vector<8x128xf32>
    %341 = arith.mulf %330, %340 : vector<8x128xf32>
    %342 = arith.addf %339, %341 : vector<8x128xf32>
    %343 = math.tanh %342 : vector<8x128xf32>
    %cst_105 = arith.constant 1.000000e+00 : f32
    %344 = vector.broadcast %cst_105 : f32 to vector<8x128xf32>
    %345 = arith.subf %344, %338 : vector<8x128xf32>
    %346 = arith.mulf %345, %343 : vector<8x128xf32>
    %347 = arith.mulf %338, %309 : vector<8x128xf32>
    %348 = arith.addf %346, %347 : vector<8x128xf32>
    %c8_i32_106 = arith.constant 8 : i32
    %349 = arith.muli %arg0, %c8_i32_106 : i32
    %350 = arith.addi %349, %c7_i32 : i32
    %c8_i32_107 = arith.constant 8 : i32
    %351 = arith.cmpi slt, %350, %c8_i32_107 : i32
    %352 = arith.select %351, %348, %309 : vector<8x128xf32>
    %353 = arith.truncf %352 : vector<8x128xf32> to vector<8x128xbf16>
    %354 = arith.index_cast %c7_i32 : i32 to index
    %c0_108 = arith.constant 0 : index
    %c0_109 = arith.constant 0 : index
    %355 = vector.load %arg7[%354, %c0_108, %c0_109] : memref<8x8x128xbf16, #tpu.memory_space<vmem>>, vector<1x8x128xbf16>
    %356 = vector.shape_cast %355 : vector<1x8x128xbf16> to vector<8x128xbf16>
    %357 = vector.shape_cast %353 : vector<8x128xbf16> to vector<1x8x128xbf16>
    tpu.vector_store %arg7[%354, %c0_108, %c0_109], %357 {strides = array<i32>} : memref<8x8x128xbf16, #tpu.memory_space<vmem>>, vector<1x8x128xbf16>,
    %c8_i32_110 = arith.constant 8 : i32
    %c0_111 = arith.constant 0 : index
    %c0_112 = arith.constant 0 : index
    %358 = vector.load %arg9[%c0_111, %c0_112] : memref<8x128xf32, #tpu.memory_space<vmem>>, vector<8x128xf32>
    tpu.vector_store %arg9[%c0_111, %c0_112], %352 {strides = array<i32>} : memref<8x128xf32, #tpu.memory_space<vmem>>, vector<8x128xf32>,
    %c0_i32_113 = arith.constant 0 : i32
    %359 = arith.cmpi eq, %arg0, %c0_i32_113 : i32
    %360 = arith.extui %359 : i1 to i32
    %c0_i32_114 = arith.constant 0 : i32
    %361 = arith.cmpi ne, %360, %c0_i32_114 : i32
    scf.if %361 {
      %c0_115 = arith.constant 0 : index
      %c0_116 = arith.constant 0 : index
      %362 = vector.load %arg8[%c0_115, %c0_116] : memref<8x128xf32, #tpu.memory_space<vmem>>, vector<8x128xf32>
      tpu.vector_store %arg8[%c0_115, %c0_116], %352 {strides = array<i32>} : memref<8x128xf32, #tpu.memory_space<vmem>>, vector<8x128xf32>,
    } else {
    }
    return
  }
  func.func @transform_0(%arg0: i32) -> (i32, i32, i32) {
    %c0_i32 = arith.constant 0 : i32
    %c0_i32_0 = arith.constant 0 : i32
    %c0_i32_1 = arith.constant 0 : i32
    return %arg0, %c0_i32, %c0_i32_0 : i32, i32, i32
  }
  func.func @transform_1(%arg0: i32) -> (i32, i32) {
    %c0_i32 = arith.constant 0 : i32
    %c0_i32_0 = arith.constant 0 : i32
    %c0_i32_1 = arith.constant 0 : i32
    return %c0_i32, %c0_i32_0 : i32, i32
  }
  func.func @transform_2(%arg0: i32) -> (i32, i32) {
    %c0_i32 = arith.constant 0 : i32
    %c0_i32_0 = arith.constant 0 : i32
    %c0_i32_1 = arith.constant 0 : i32
    return %c0_i32, %c0_i32_0 : i32, i32
  }
  func.func @transform_3(%arg0: i32) -> (i32, i32) {
    %c0_i32 = arith.constant 0 : i32
    %c0_i32_0 = arith.constant 0 : i32
    %c0_i32_1 = arith.constant 0 : i32
    return %c0_i32, %c0_i32_0 : i32, i32
  }
  func.func @transform_4(%arg0: i32) -> (i32, i32) {
    %c0_i32 = arith.constant 0 : i32
    %c0_i32_0 = arith.constant 0 : i32
    %c0_i32_1 = arith.constant 0 : i32
    return %c0_i32, %c0_i32_0 : i32, i32
  }
  func.func @transform_5(%arg0: i32) -> (i32, i32) {
    %c0_i32 = arith.constant 0 : i32
    %c0_i32_0 = arith.constant 0 : i32
    %c0_i32_1 = arith.constant 0 : i32
    return %c0_i32, %c0_i32_0 : i32, i32
  }
  func.func @transform_6(%arg0: i32) -> (i32, i32, i32) {
    %c0_i32 = arith.constant 0 : i32
    %c0_i32_0 = arith.constant 0 : i32
    %c0_i32_1 = arith.constant 0 : i32
    return %arg0, %c0_i32, %c0_i32_0 : i32, i32, i32
  }
  func.func @transform_7(%arg0: i32) -> (i32, i32) {
    %c0_i32 = arith.constant 0 : i32
    %c0_i32_0 = arith.constant 0 : i32
    %c0_i32_1 = arith.constant 0 : i32
    return %c0_i32, %c0_i32_0 : i32, i32
  }
}

</mosaic_0001>

<bundles_post_ra>
// kernel: tpu_custom_call.1
= control target key start
LH: loop header
LB: loop body
LE: loop exit
PB: predicated region body
PF: predicated region fallthrough
CT: control target
= control target key end

     0   :  { %13 = vsyncpa [#allocation5], 0  ;;  %s4182_s0 = inlined_call_operand.hbm [shape: bf16[8,8,128], index: 0, kind: input, shape index: {}]   ;;  %s4183_s1 = inlined_call_operand.hbm [shape: f32[8,128], index: 1, kind: input, shape index: {}]   ;;  %s4184_s2 = inlined_call_operand.hbm [shape: bf16[128,384], index: 2, kind: input, shape index: {}]   ;;  %s4185_s3 = inlined_call_operand.vmem [shape: f32[1,384], index: 3, kind: input, shape index: {}]   ;;  %s4186_s4 = inlined_call_operand.hbm [shape: bf16[128,384], index: 4, kind: input, shape index: {}]   ;;  %s4187_s5 = inlined_call_operand.vmem [shape: f32[1,384], index: 5, kind: input, shape index: {}]   ;;  %s4188_s6 = inlined_call_operand.hbm [shape: bf16[8,8,128], index: 6, kind: output, shape index: {0}]   ;;  %s4189_s7 = inlined_call_operand.hbm [shape: f32[8,128], index: 7, kind: output, shape index: {1}]  }
   0x1   :  { %14 = vsyncpa [#allocation8], 0 }
   0x2   :  { %15 = vsyncpa [#allocation11], 0 }
   0x3   :  { %16 = vsyncpa [#allocation6], 0 }
   0x4   :  { %17 = vsyncpa [#allocation14], 0  ;;  %s3600_s24 = smov [#allocation7]   ;;  %s3601_s26 = smov [#allocation4]  }
   0x5   :  { %s36_s25 = sshll.u32 %s3600_s24, 4  ;;  %s23_s27 = sshll.u32 %s3601_s26, 4  ;;  %s37_s25 = int_to_ptr.vmem [resolvable:$true] %s36_s25  ;;  %s3653_s27 = int_to_ptr.vmem [resolvable:$true] %s23_s27 }
   0x6   :  { %s3458_s30 = scalar_lea.hbm %s4183_s1, 128 }
   0x7   :  { %p3459_p0 = scmp.ne.s32.totalorder %s4183_s1, %s3458_s30  ;;  %p3462_p1 = scmp.lt.u32.totalorder %s3458_s30, %s4183_s1 }
   0x9   :  { %p3464_p2 = pnand %p3462_p1, %p3459_p0 }
   0xb   :  { %3467 = shalt.err (!%p3464_p2)
}
   0xc   :  { %s3468_s12 = scalar_lea.vmem %s37_s25, 128  ;;  %p3473_p4 = scmp.lt.s32.totalorder %s37_s25, %s37_s25 }
   0xd   :  { %p3469_p3 = scmp.ne.s32.totalorder %s37_s25, %s3468_s12  ;;  %p3474_p5 = scmp.lt.s32.totalorder %s3468_s12, %s3468_s12 }
   0xf   :  { %p3475_p6 = por %p3474_p5, %p3473_p4 }
  0x11   :  { %p3476_p7 = pnand %p3475_p6, %p3469_p3 }
  0x13   :  { %3479 = shalt.err (!%p3476_p7)
}
  0x14   :  { %39 = dma.hbm_to_vmem [thread:$0]  %s4183_s1, 128, %s37_s25, [#allocation8]  }
  0x15   :  { %s3480_s17 = scalar_lea.hbm %s4182_s0, 512 }
  0x16   :  { %p3481_p8 = scmp.ne.s32.totalorder %s4182_s0, %s3480_s17  ;;  %p3484_p9 = scmp.lt.u32.totalorder %s3480_s17, %s4182_s0 }
  0x18   :  { %p3486_p10 = pnand %p3484_p9, %p3481_p8 }
  0x1a   :  { %3489 = shalt.err (!%p3486_p10)
}
  0x1b   :  { %s3490_s22 = scalar_lea.vmem %s3653_s27, 512  ;;  %p3495_p12 = scmp.lt.s32.totalorder %s3653_s27, %s3653_s27 }
  0x1c   :  { %p3491_p11 = scmp.ne.s32.totalorder %s3653_s27, %s3490_s22  ;;  %p3496_p13 = scmp.lt.s32.totalorder %s3490_s22, %s3490_s22 }
  0x1e   :  { %p3497_p0 = por %p3496_p13, %p3495_p12 }
  0x20   :  { %p3498_p1 = pnand %p3497_p0, %p3491_p11 }
  0x22   :  { %3501 = shalt.err (!%p3498_p1)
}
  0x23   :  { %s3602_s1 = smov 64   ;;  %s3603_s23 = smov 4  }
  0x24   :  { %29 = dma.hbm_to_vmem [thread:$0]  %s4182_s0, 512, %s3653_s27, [#allocation5], %s3602_s1, %s3602_s1, %s3603_s23  }
  0x25   :  { %s3604_s26 = smov [#allocation9]   ;;  %s3502_s8 = scalar_lea.hbm %s4184_s2, 3072 }
  0x26   :  { %s45_s28 = sshll.u32 %s3604_s26, 4  ;;  %p3503_p2 = scmp.ne.s32.totalorder %s4184_s2, %s3502_s8  ;;  %s46_s28 = int_to_ptr.vmem [resolvable:$true] %s45_s28 }
  0x27   :  { %p3506_p3 = scmp.lt.u32.totalorder %s3502_s8, %s4184_s2 }
  0x29   :  { %p3508_p4 = pnand %p3506_p3, %p3503_p2 }
  0x2b   :  { %3511 = shalt.err (!%p3508_p4)
}
  0x2c   :  { %s3512_s13 = scalar_lea.vmem %s46_s28, 3072  ;;  %p3517_p6 = scmp.lt.s32.totalorder %s46_s28, %s46_s28 }
  0x2d   :  { %p3513_p5 = scmp.ne.s32.totalorder %s46_s28, %s3512_s13  ;;  %p3518_p7 = scmp.lt.s32.totalorder %s3512_s13, %s3512_s13 }
  0x2f   :  { %p3519_p8 = por %p3518_p7, %p3517_p6 }
  0x31   :  { %p3520_p9 = pnand %p3519_p8, %p3513_p5 }
  0x33   :  { %3523 = shalt.err (!%p3520_p9)
}
  0x34   :  { %s3605_s0 = smov 192   ;;  %s3606_s27 = smov 12  }
  0x35   :  { %51 = dma.hbm_to_vmem [thread:$0]  %s4184_s2, 3072, %s46_s28, [#allocation8], %s3605_s0, %s3605_s0, %s3606_s27  }
  0x36   :  { %s3607_s16 = smov [#allocation10]   ;;  %s3524_s20 = scalar_lea.hbm %s4186_s4, 3072 }
  0x37   :  { %s59_s17 = sshll.u32 %s3607_s16, 4  ;;  %p3525_p10 = scmp.ne.s32.totalorder %s4186_s4, %s3524_s20  ;;  %s60_s17 = int_to_ptr.vmem [resolvable:$true] %s59_s17 }
  0x38   :  { %p3528_p11 = scmp.lt.u32.totalorder %s3524_s20, %s4186_s4 }
  0x3a   :  { %p3530_p12 = pnand %p3528_p11, %p3525_p10 }
  0x3c   :  { %3533 = shalt.err (!%p3530_p12)
}
  0x3d   :  { %s3534_s26 = scalar_lea.vmem %s60_s17, 3072  ;;  %p3539_p0 = scmp.lt.s32.totalorder %s60_s17, %s60_s17 }
  0x3e   :  { %p3535_p13 = scmp.ne.s32.totalorder %s60_s17, %s3534_s26  ;;  %p3540_p1 = scmp.lt.s32.totalorder %s3534_s26, %s3534_s26 }
  0x40   :  { %p3541_p2 = por %p3540_p1, %p3539_p0 }
  0x42   :  { %p3542_p3 = pnand %p3541_p2, %p3535_p13 }
  0x44   :  { %3545 = shalt.err (!%p3542_p3)
}
  0x45   :  { %65 = dma.hbm_to_vmem [thread:$0]  %s4186_s4, 3072, %s60_s17, [#allocation11], %s3605_s0, %s3605_s0, %s3606_s27  }
  0x46   :  { %3590 = dma.done.wait [#allocation5], 512  }
  0x47   :  { %3591 = vsyncadd [#allocation5], 4294966784 }
  0x48   :  { %3592 = dma.done.wait [#allocation8], 3200  }
  0x49   :  { %3593 = vsyncadd [#allocation8], 4294964096 }
  0x4a   :  { %3594 = dma.done.wait [#allocation11], 3072  }
  0x4b   :  { %3595 = vsyncadd [#allocation11], 4294964224  ;;  %v4192_v0 = vmov 0   ;;  %v3230_v1 = vld [vmem:[#allocation9 + $0x4] ss:$12 sps:$4 sm:$0xff]   ;;  %v3256_v12 = vld [vmem:[#allocation4] sm:$0xff]  }
  0x4c   :  { %328 = vmatprep.mubr.bf16.mxu0 %v4192_v0  ;;  %v3232_v2 = vld [vmem:[#allocation9] ss:$12 sps:$4 sm:$0xff]   ;;  %296 = vmatprep.subr.bf16.mxu0 %v3230_v1  ;;  %v3233_v3 = vld [vmem:[#allocation9 + $0x1c] ss:$12 sps:$4 sm:$0xff]   ;;  %v3235_v4 = vld [vmem:[#allocation9 + $0x18] ss:$12 sps:$4 sm:$0xff]   ;;  %v129_v1 = vlaneseq }
  0x4d   :  { %297 = vmatpush1.bf16.msra.mxu0 %v3232_v2  ;;  %v3236_v5 = vld [vmem:[#allocation9 + $0x34] ss:$12 sps:$4 sm:$0xff]   ;;  %v3238_v6 = vld [vmem:[#allocation9 + $0x30] ss:$12 sps:$4 sm:$0xff]   ;;  %v3239_v7 = vld [vmem:[#allocation9 + $0x4c] ss:$12 sps:$4 sm:$0xff]   ;;  %3049 = vmatprep.mubr.bf16.mxu1 %v3256_v12 }
  0x4e   :  { %298 = vmatprep.subr.bf16.mxu0 %v3233_v3  ;;  %v3251_v8 = vld [vmem:[#allocation9 + $0x8] ss:$12 sps:$4 sm:$0xff]   ;;  %v3242_v10 = vld [vmem:[#allocation9 + $0x64] ss:$12 sps:$4 sm:$0xff]   ;;  %v3255_v11 = vld [vmem:[#allocation9 + $0x20] ss:$12 sps:$4 sm:$0xff]  }
  0x4f   :  { %v3241_v9 = vld [vmem:[#allocation9 + $0x48] ss:$12 sps:$4 sm:$0xff]   ;;  %3033 = vmatprep.subr.bf16.mxu1 %v3251_v8  ;;  %v3244_v13 = vld [vmem:[#allocation9 + $0x60] ss:$12 sps:$4 sm:$0xff]   ;;  %v3260_v14 = vld [vmem:[#allocation9 + $0x38] ss:$12 sps:$4 sm:$0xff]  }
  0x50   :  { %3034 = vmatpush3.bf16.msra.mxu1 %v3251_v8  ;;  %v3245_v15 = vld [vmem:[#allocation9 + $0x7c] ss:$12 sps:$4 sm:$0xff]   ;;  %v3247_v17 = vld [vmem:[#allocation9 + $0x78] ss:$12 sps:$4 sm:$0xff]   ;;  %v3248_v18 = vld [vmem:[#allocation9 + $0x94] ss:$12 sps:$4 sm:$0xff]  }
  0x51   :  { %299 = vmatpush1.bf16.msra.mxu0 %v3235_v4  ;;  %3035 = vmatprep.subr.bf16.mxu1 %v3255_v11  ;;  %v3264_v16 = vld [vmem:[#allocation9 + $0x50] ss:$12 sps:$4 sm:$0xff]   ;;  %v3269_v19 = vld [vmem:[#allocation9 + $0x68] ss:$12 sps:$4 sm:$0xff]   ;;  %v3252_v21 = vld [vmem:[#allocation9 + $0xac] ss:$12 sps:$4 sm:$0xff]  }
  0x52   :  { %300 = vmatprep.subr.bf16.mxu0 %v3236_v5  ;;  %v3250_v20 = vld [vmem:[#allocation9 + $0x90] ss:$12 sps:$4 sm:$0xff]   ;;  %v3273_v22 = vld [vmem:[#allocation9 + $0x80] ss:$12 sps:$4 sm:$0xff]   ;;  %v3254_v23 = vld [vmem:[#allocation9 + $0xa8] ss:$12 sps:$4 sm:$0xff]  }
  0x53   :  { %v3712_v24 = vld [vmem:[#allocation10 + $0x4] ss:$12 sps:$4 sm:$0xff]   ;;  %v3714_v26 = vld [vmem:[#allocation10] ss:$12 sps:$4 sm:$0xff]   ;;  %v3717_v27 = vld [vmem:[#allocation10 + $0x1c] ss:$12 sps:$4 sm:$0xff]  }
  0x54   :  { %3036 = vmatpush3.bf16.msra.mxu1 %v3255_v11  ;;  %v3278_v25 = vld [vmem:[#allocation9 + $0x98] ss:$12 sps:$4 sm:$0xff]   ;;  %v3282_v28 = vld [vmem:[#allocation9 + $0xb0] ss:$12 sps:$4 sm:$0xff]   ;;  %v3724_v30 = vld [vmem:[#allocation10 + $0x34] ss:$12 sps:$4 sm:$0xff]  }
  0x55   :  { %301 = vmatpush1.bf16.msra.mxu0 %v3238_v6  ;;  %3037 = vmatprep.subr.bf16.mxu1 %v3260_v14  ;;  %v3720_v29 = vld [vmem:[#allocation10 + $0x18] ss:$12 sps:$4 sm:$0xff]   ;;  %v3727_v32 = vld [vmem:[#allocation10 + $0x30] ss:$12 sps:$4 sm:$0xff]   ;;  %v3732_v34 = vld [vmem:[#allocation10 + $0x48] ss:$12 sps:$4 sm:$0xff]  }
  0x56   :  { %302 = vmatprep.subr.bf16.mxu0 %v3239_v7  ;;  %v3265_v31 = vld [vmem:[#allocation4 + $0x8] sm:$0xff]   ;;  %v3730_v33 = vld [vmem:[#allocation10 + $0x4c] ss:$12 sps:$4 sm:$0xff]   ;;  %v3287_v36 = vld [vmem:[#allocation10 + $0x8] ss:$12 sps:$4 sm:$0xff]   ;;  %v4190_v38 = vmov 0.0  }
  0x57   :  { %v3274_v35 = vld [vmem:[#allocation4 + $0x10] sm:$0xff]   ;;  %v3734_v37 = vld [vmem:[#allocation10 + $0x64] ss:$12 sps:$4 sm:$0xff]   ;;  %v3749_v45 = vld [vmem:[#allocation10 + $0x94] ss:$12 sps:$4 sm:$0xff]   ;;  %vm3610_vm0 = vmmov 0  }
  0x58   :  { %3038 = vmatpush3.bf16.msra.mxu1 %v3260_v14  ;;  %v3291_v39 = vld [vmem:[#allocation10 + $0x20] ss:$12 sps:$4 sm:$0xff]   ;;  %v3742_v41 = vld [vmem:[#allocation10 + $0x7c] ss:$12 sps:$4 sm:$0xff]   ;;  %v3292_v42 = vld [vmem:[#allocation10 + $0x38] ss:$12 sps:$4 sm:$0xff]  }
  0x59   :  { %303 = vmatpush1.bf16.msra.mxu0 %v3241_v9  ;;  %3039 = vmatprep.subr.bf16.mxu1 %v3264_v16  ;;  %v3740_v40 = vld [vmem:[#allocation10 + $0x60] ss:$12 sps:$4 sm:$0xff]   ;;  %v3283_v43 = vld [vmem:[#allocation4 + $0x18] sm:$0xff]   ;;  %v3747_v44 = vld [vmem:[#allocation10 + $0x78] ss:$12 sps:$4 sm:$0xff]   ;;  %v3807_v2 = vshrl.u32 %v129_v1, 7 }
  0x5a   :  { %304 = vmatprep.subr.bf16.mxu0 %v3242_v10  ;;  %v3293_v46 = vld [vmem:[#allocation10 + $0x50] ss:$12 sps:$4 sm:$0xff]   ;;  %v3759_v48 = vld [vmem:[#allocation10 + $0xac] ss:$12 sps:$4 sm:$0xff]   ;;  %v3294_v49 = vld [vmem:[#allocation10 + $0x68] ss:$12 sps:$4 sm:$0xff]  }
  0x5b   :  { %v3755_v47 = vld [vmem:[#allocation10 + $0x90] ss:$12 sps:$4 sm:$0xff]   ;;  %v3764_v50 = vld [vmem:[#allocation10 + $0xa8] ss:$12 sps:$4 sm:$0xff]   ;;  %v3295_v52 = vld [vmem:[#allocation10 + $0x80] ss:$12 sps:$4 sm:$0xff]  }
  0x5c   :  { %3040 = vmatpush3.bf16.msra.mxu1 %v3264_v16  ;;  %v3766_v51 = vld [vmem:[#allocation7] sm:$0xff]  ;;  %v3298_v56 = vld [vmem:[#allocation10 + $0x8] ss:$12 sps:$4 sm:$0xff]   ;;  %v3299_v57 = vld [vmem:[#allocation10 + $0x20] ss:$12 sps:$4 sm:$0xff]   ;;  %v131_v3 = vsub.s32 0, %v3807_v2 }
  0x5d   :  { %305 = vmatpush1.bf16.msra.mxu0 %v3244_v13  ;;  %3041 = vmatprep.subr.bf16.mxu1 %v3269_v19  ;;  %v460_v53 = vpack.c.bf16 %v3766_v51, %v3766_v51  ;;  %v3296_v54 = vld [vmem:[#allocation10 + $0x98] ss:$12 sps:$4 sm:$0xff]   ;;  %v3297_v55 = vld [vmem:[#allocation10 + $0xb0] ss:$12 sps:$4 sm:$0xff]   ;;  %v3302_v60 = vld [vmem:[#allocation10 + $0x68] ss:$12 sps:$4 sm:$0xff]  }
  0x5e   :  { %306 = vmatprep.subr.bf16.mxu0 %v3245_v15  ;;  %v3300_v58 = vld [vmem:[#allocation10 + $0x38] ss:$12 sps:$4 sm:$0xff]   ;;  %v3301_v59 = vld [vmem:[#allocation10 + $0x50] ss:$12 sps:$4 sm:$0xff]   ;;  %v3303_v61 = vld [vmem:[#allocation10 + $0x80] ss:$12 sps:$4 sm:$0xff]  }
  0x5f   :  { %v3304_v62 = vld [vmem:[#allocation10 + $0x98] ss:$12 sps:$4 sm:$0xff]   ;;  %v3305_v63 = vld [vmem:[#allocation10 + $0xb0] ss:$12 sps:$4 sm:$0xff]   ;;  %v135_v5 = vsub.s32 1, %v3807_v2  ;;  %v4194_v13 = vsub.s32 2, %v3807_v2 }
  0x60   :  { %3042 = vmatpush3.bf16.msra.mxu1 %v3269_v19  ;;  %v127_v4 = vld [vmem:[%s4185_s3] sm:$0x7]  ;;  %s3612_s9 = smov [#allocation12]  }
  0x61   :  { %307 = vmatpush1.bf16.msra.mxu0 %v3247_v17  ;;  %3043 = vmatprep.subr.bf16.mxu1 %v3273_v22  ;;  %v132_v7 = vrot.slane %v127_v4, %v131_v3  ;;  %v136_v9 = vrot.slane %v127_v4, %v135_v5  ;;  %v3821_v15 = vrot.slane %v127_v4, %v4194_v13  ;;  %s2685_s10 = sshll.u32 %s3612_s9, 4  ;;  %s4148_s10 = int_to_ptr.vmem [resolvable:$true] %s2685_s10 }
  0x62   :  { %308 = vmatprep.subr.bf16.mxu0 %v3248_v18 }
  0x64   :  { %3044 = vmatpush3.bf16.msra.mxu1 %v3273_v22 }
  0x65   :  { %309 = vmatpush1.bf16.msra.mxu0 %v3250_v20  ;;  %3045 = vmatprep.subr.bf16.mxu1 %v3278_v25 }
  0x66   :  { %310 = vmatprep.subr.bf16.mxu0 %v3252_v21 }
  0x68   :  { %3046 = vmatpush3.bf16.msra.mxu1 %v3278_v25 }
  0x69   :  { %311 = vmatpush1.bf16.msra.mxu0 %v3254_v23  ;;  %3047 = vmatprep.subr.bf16.mxu1 %v3282_v28 }
  0x6a   :  { %637 = vmatprep.subr.bf16.mxu0 %v3712_v24 }
  0x6c   :  { %329 = vmatmul.mubr.bf16.vlgmr.msra.gmra.mrb[0].mxu0 %v3256_v12  ;;  %3048 = vmatpush3.bf16.msra.mxu1 %v3282_v28 }
  0x6d   :  { %638 = vmatpush1.bf16.msra.mxu0 %v3714_v26  ;;  %338 = vmatprep.mubr.bf16.mxu0 %v4192_v0 }
  0x6e   :  { %639 = vmatprep.subr.bf16.mxu0 %v3717_v27  ;;  %3057 = vmatprep.subr.bf16.mxu1 %v4190_v38 }
  0x6f   :  { %3050 = vmatmul.mubr.bf16.vlgmr.msra.gmra.mrb[0].mxu1 %v3265_v31 }
  0x70   :  { %3058 = vmatpush3.bf16.msra.mxu1 %v3287_v36  ;;  %3053 = vmatprep.mubr.bf16.mxu1 %v3274_v35 }
  0x71   :  { %640 = vmatpush1.bf16.msra.mxu0 %v3720_v29  ;;  %3059 = vmatprep.subr.bf16.mxu1 %v4190_v38 }
  0x72   :  { %641 = vmatprep.subr.bf16.mxu0 %v3724_v30 }
  0x74   :  { %339 = vmatmul.mubr.bf16.gmra.mrb[4].mxu0 %v3265_v31  ;;  %3060 = vmatpush3.bf16.msra.mxu1 %v3291_v39 }
  0x75   :  { %642 = vmatpush1.bf16.msra.mxu0 %v3727_v32  ;;  %348 = vmatprep.mubr.bf16.mxu0 %v4192_v0 }
  0x76   :  { %643 = vmatprep.subr.bf16.mxu0 %v3730_v33  ;;  %3061 = vmatprep.subr.bf16.mxu1 %v4190_v38 }
  0x77   :  { %3054 = vmatmul.mubr.bf16.gmra.mrb[4].mxu1 %v3283_v43 }
  0x78   :  { %3062 = vmatpush3.bf16.msra.mxu1 %v3292_v42  ;;  %3073 = vmatprep.mubr.msk.bf16.mxu1 %vm3610_vm0, %v4190_v38 }
  0x79   :  { %644 = vmatpush1.bf16.msra.mxu0 %v3732_v34  ;;  %3063 = vmatprep.subr.bf16.mxu1 %v4190_v38 }
  0x7a   :  { %645 = vmatprep.subr.bf16.mxu0 %v3734_v37 }
  0x7c   :  { %349 = vmatmul.mubr.bf16.gmra.mrb[8].mxu0 %v3274_v35  ;;  %3064 = vmatpush3.bf16.msra.mxu1 %v3293_v46 }
  0x7d   :  { %646 = vmatpush1.bf16.msra.mxu0 %v3740_v40  ;;  %358 = vmatprep.mubr.bf16.mxu0 %v4192_v0 }
  0x7e   :  { %647 = vmatprep.subr.bf16.mxu0 %v3742_v41  ;;  %3065 = vmatprep.subr.bf16.mxu1 %v4190_v38 }
  0x80   :  { %3066 = vmatpush3.bf16.msra.mxu1 %v3294_v49 }
  0x81   :  { %648 = vmatpush1.bf16.msra.mxu0 %v3747_v44  ;;  %3067 = vmatprep.subr.bf16.mxu1 %v4190_v38 }
  0x82   :  { %649 = vmatprep.subr.bf16.mxu0 %v3749_v45 }
  0x84   :  { %359 = vmatmul.mubr.bf16.gmra.mrb[12].mxu0 %v3283_v43  ;;  %3068 = vmatpush3.bf16.msra.mxu1 %v3295_v52 }
  0x85   :  { %650 = vmatpush1.bf16.msra.mxu0 %v3755_v47  ;;  %669 = vmatprep.mubr.bf16.mxu0 %v4192_v0 }
  0x86   :  { %651 = vmatprep.subr.bf16.mxu0 %v3759_v48  ;;  %3069 = vmatprep.subr.bf16.mxu1 %v4190_v38 }
  0x88   :  { %3070 = vmatpush3.bf16.msra.mxu1 %v3296_v54 }
  0x89   :  { %652 = vmatpush1.bf16.msra.mxu0 %v3764_v50  ;;  %3071 = vmatprep.subr.bf16.mxu1 %v4190_v38 }
  0x8a   :  { %910 = vmatprep.subr.bf16.mxu0 %v3712_v24 }
  0x8c   :  { %670 = vmatmul.mubr.bf16.vlgmr.msra.gmra.mrb[16].mxu0 %v460_v53  ;;  %3072 = vmatpush3.bf16.msra.mxu1 %v3297_v55 }
  0x8d   :  { %911 = vmatpush1.bf16.msra.mxu0 %v3714_v26  ;;  %942 = vmatprep.mubr.bf16.mxu0 %v4192_v0 }
  0x8e   :  { %912 = vmatprep.subr.bf16.mxu0 %v3717_v27  ;;  %3077 = vmatprep.subr.bf16.mxu1 %v4190_v38 }
  0x8f   :  { %3074 = vmatmul.mubr.bf16.vlgmr.msra.gmra.mrb[8].mxu1 %v460_v53 }
  0x90   :  { %3093 = vmatprep.mubr.msk.bf16.mxu1 %vm3610_vm0, %v4190_v38  ;;  %3078 = vmatpush3.bf16.msra.mxu1 %v3298_v56 }
  0x91   :  { %913 = vmatpush1.bf16.msra.mxu0 %v3720_v29  ;;  %3079 = vmatprep.subr.bf16.mxu1 %v4190_v38 }
  0x92   :  { %914 = vmatprep.subr.bf16.mxu0 %v3724_v30 }
  0x94   :  { %3080 = vmatpush3.bf16.msra.mxu1 %v3299_v57 }
  0x95   :  { %915 = vmatpush1.bf16.msra.mxu0 %v3727_v32  ;;  %3081 = vmatprep.subr.bf16.mxu1 %v4190_v38 }
  0x96   :  { %916 = vmatprep.subr.bf16.mxu0 %v3730_v33 }
  0x98   :  { %3082 = vmatpush3.bf16.msra.mxu1 %v3300_v58 }
  0x99   :  { %917 = vmatpush1.bf16.msra.mxu0 %v3732_v34  ;;  %3083 = vmatprep.subr.bf16.mxu1 %v4190_v38 }
  0x9a   :  { %918 = vmatprep.subr.bf16.mxu0 %v3734_v37 }
  0x9c   :  { %3084 = vmatpush3.bf16.msra.mxu1 %v3301_v59 }
  0x9d   :  { %919 = vmatpush1.bf16.msra.mxu0 %v3740_v40  ;;  %3085 = vmatprep.subr.bf16.mxu1 %v4190_v38 }
  0x9e   :  { %920 = vmatprep.subr.bf16.mxu0 %v3742_v41 }
  0xa0   :  { %3086 = vmatpush3.bf16.msra.mxu1 %v3302_v60 }
  0xa1   :  { %921 = vmatpush1.bf16.msra.mxu0 %v3747_v44  ;;  %3087 = vmatprep.subr.bf16.mxu1 %v4190_v38 }
  0xa2   :  { %922 = vmatprep.subr.bf16.mxu0 %v3749_v45 }
  0xa4   :  { %3088 = vmatpush3.bf16.msra.mxu1 %v3303_v61 }
  0xa5   :  { %923 = vmatpush1.bf16.msra.mxu0 %v3755_v47  ;;  %3089 = vmatprep.subr.bf16.mxu1 %v4190_v38 }
  0xa6   :  { %924 = vmatprep.subr.bf16.mxu0 %v3759_v48 }
  0xa8   :  { %3090 = vmatpush3.bf16.msra.mxu1 %v3304_v62 }
  0xa9   :  { %925 = vmatpush1.bf16.msra.mxu0 %v3764_v50  ;;  %3091 = vmatprep.subr.bf16.mxu1 %v4190_v38 }
  0xaa   :  { %1185 = vmatprep.subr.bf16.mxu0 %v3712_v24 }
  0xac   :  { %3092 = vmatpush3.bf16.msra.mxu1 %v3305_v63 }
  0xad   :  { %3097 = vmatprep.subr.bf16.mxu1 %v4190_v38 }
 0x13f   :  { %v330_v6 = vpop.f32.mrb[0].mxu0 }
 0x140   :  { %v332_v8 = vpop.f32.mrb[1].mxu0 }
 0x141   :  { %v334_v10 = vpop.f32.mrb[2].mxu0 }
 0x142   :  { %v3814_v11 = vadd.f32 %v334_v10, %v132_v7  ;;  %v336_v12 = vpop.f32.mrb[3].mxu0  ;;  %v3051_v21 = vpop.f32.mrb[0].mxu1 }
 0x143   :  { %v3817_v14 = vadd.f32 %v336_v12, %v136_v9  ;;  %v3830_v25 = vadd.f32 %v3051_v21, %v3821_v15  ;;  %v403_v28 = vpop.f32.mrb[1].mxu1 }
 0x144   :  { %v3052_v35 = vpop.f32.mrb[2].mxu1 }
 0x145   :  { %v3835_v36 = vadd.f32 %v3052_v35, %v3821_v15  ;;  %v406_v39 = vpop.f32.mrb[3].mxu1 }
 0x146   :  { %v3838_v42 = vadd.f32 %v406_v39, %v3821_v15 }
 0x147   :  { %v340_v16 = vpop.f32.mrb[4].mxu0 }
 0x148   :  { %v3823_v17 = vadd.f32 %v340_v16, %v132_v7  ;;  %v342_v18 = vpop.f32.mrb[5].mxu0 }
 0x149   :  { %v3825_v19 = vadd.f32 %v342_v18, %v136_v9  ;;  %v344_v20 = vpop.f32.mrb[6].mxu0 }
 0x14a   :  { %v3827_v22 = vadd.f32 %v344_v20, %v132_v7  ;;  %v346_v23 = vpop.f32.mrb[7].mxu0  ;;  %v3055_v54 = vpop.f32.mrb[4].mxu1  ;;  %v458_v20 = vld [vmem:[%s4187_s5] sm:$0x7]  ;;  %s3611_s5 = smov [#allocation13]  }
 0x14b   :  { %v3832_v31 = vadd.f32 %v346_v23, %v136_v9  ;;  %v3847_v57 = vadd.f32 %v3055_v54, %v3821_v15  ;;  %v419_v58 = vpop.f32.mrb[5].mxu1  ;;  %v3871_v39 = vrot.slane %v458_v20, %v131_v3  ;;  %s2698_s8 = sshll.u32 %s3611_s5, 4  ;;  %s2699_s8 = int_to_ptr.vmem [resolvable:$true] %s2698_s8 }
 0x14c   :  { %v3852_v60 = vadd.f32 %v419_v58, %v3821_v15  ;;  %v3056_v61 = vpop.f32.mrb[6].mxu1  ;;  %v333_v58 = vadd.f32 %v332_v8, %v136_v9  ;;  %s3546_s11 = scalar_lea.vmem %s2699_s8, 128  ;;  %p3551_p5 = scmp.lt.s32.totalorder %s2699_s8, %s2699_s8 }
 0x14d   :  { %v3855_v62 = vadd.f32 %v3056_v61, %v3821_v15  ;;  %v422_v63 = vpop.f32.mrb[7].mxu1  ;;  %p3547_p4 = scmp.ne.s32.totalorder %s2699_s8, %s3546_s11  ;;  %p3552_p6 = scmp.lt.s32.totalorder %s3546_s11, %s3546_s11 }
 0x14e   :  { %v3858_v1 = vadd.f32 %v422_v63, %v3821_v15 }
 0x14f   :  { %v350_v43 = vpop.f32.mrb[8].mxu0  ;;  %4195 = vst [vmem:[#allocation20_spill] sm:$0xff] %v3855_v62  ;;  %p3553_p7 = por %p3552_p6, %p3551_p5 }
 0x150   :  { %v3840_v46 = vadd.f32 %v350_v43, %v132_v7  ;;  %v352_v49 = vpop.f32.mrb[9].mxu0  ;;  %v3873_v43 = vrot.slane %v458_v20, %v135_v5 }
 0x151   :  { %v3842_v52 = vadd.f32 %v352_v49, %v136_v9  ;;  %v354_v53 = vpop.f32.mrb[10].mxu0  ;;  %p3554_p8 = pnand %p3553_p7, %p3547_p4 }
 0x152   :  { %v3844_v55 = vadd.f32 %v354_v53, %v132_v7  ;;  %v356_v56 = vpop.f32.mrb[11].mxu0  ;;  %v331_v53 = vadd.f32 %v330_v6, %v132_v7 }
 0x153   :  { %v3849_v59 = vadd.f32 %v356_v56, %v136_v9 }
 0x157   :  { %v360_v4 = vpop.f32.mrb[12].mxu0 }
 0x158   :  { %v3860_v10 = vadd.f32 %v360_v4, %v132_v7  ;;  %v362_v12 = vpop.f32.mrb[13].mxu0 }
 0x159   :  { %v3862_v16 = vadd.f32 %v362_v12, %v136_v9  ;;  %v364_v18 = vpop.f32.mrb[14].mxu0 }
 0x15a   :  { %v3867_v21 = vadd.f32 %v364_v18, %v132_v7  ;;  %v366_v23 = vpop.f32.mrb[15].mxu0  ;;  %v4196_v7 = vsub.s32 2, %v3807_v2 }
 0x15b   :  { %v3869_v35 = vadd.f32 %v366_v23, %v136_v9 }
 0x15c   :  { %v3879_v8 = vrot.slane %v458_v20, %v4196_v7 }
 0x15f   :  { %v671_v49 = vpop.f32.mrb[16].mxu0 }
 0x160   :  { %v672_v54 = vadd.f32 %v671_v49, %v3871_v39  ;;  %v673_v56 = vpop.f32.mrb[17].mxu0 }
 0x161   :  { %v674_v61 = vadd.f32 %v673_v56, %v3873_v43  ;;  %v675_v63 = vpop.f32.mrb[18].mxu0 }
 0x162   :  { %v721_v4 = vadd.f32 %v672_v54, %v331_v53  ;;  %v676_v12 = vpop.f32.mrb[19].mxu0  ;;  %v712_v0 = vpop.f32.mrb[8].mxu1 }
 0x163   :  { %v728_v18 = vadd.f32 %v674_v61, %v333_v58  ;;  %v3075_v3 = vpop.f32.mrb[9].mxu1  ;;  %v713_v53 = vadd.f32 %v712_v0, %v3879_v8  ;;  %v4197_v0 = vmov 0   ;;  %v3308_v12 = vld [vmem:[#allocation10 + $0x38] ss:$12 sps:$4 sm:$0xff]  }
 0x164   :  { %v2765_v38 = vmul.f32 -1.442695, %v721_v4  ;;  %v715_v13 = vpop.f32.mrb[10].mxu1  ;;  %v3311_v3 = vld [vmem:[#allocation10 + $0x80] ss:$12 sps:$4 sm:$0xff]  }
 0x165   :  { %v2766_v23 = vmul.f32 -1.442695, %v728_v18  ;;  %v3076_v5 = vpop.f32.mrb[11].mxu1  ;;  %v3309_v18 = vld [vmem:[#allocation10 + $0x50] ss:$12 sps:$4 sm:$0xff]  }
 0x166   :  { %3378 = vpow2.f32 %v2765_v38  ;;  %v404_v38 = vadd.f32 %v403_v28, %v3821_v15  ;;  %v4198_v15 = vmov 0.0   ;;  %v3307_v28 = vld [vmem:[#allocation10 + $0x20] ss:$12 sps:$4 sm:$0xff]   ;;  %v3313_v5 = vld [vmem:[#allocation10 + $0xb0] ss:$12 sps:$4 sm:$0xff]  }
 0x167   :  { %3380 = vpow2.f32 %v2766_v23  ;;  %v3310_v23 = vld [vmem:[#allocation10 + $0x68] ss:$12 sps:$4 sm:$0xff]  }
 0x170   :  { %v3379_v62 = vpop.eup %3378 }
 0x171   :  { %v725_v6 = vadd.f32 1.0, %v3379_v62  ;;  %v3381_v9 = vpop.eup %3380 }
 0x172   :  { %v732_v49 = vadd.f32 1.0, %v3381_v9 }
 0x173   :  { %3382 = vrcp.f32 %v725_v6 }
 0x174   :  { %3384 = vrcp.f32 %v732_v49 }
 0x17d   :  { %v3383_v54 = vpop.eup %3382 }
 0x17e   :  { %v735_v56 = vmul.f32 %v3383_v54, %v713_v53  ;;  %v3385_v13 = vpop.eup %3384 }
 0x17f   :  { %v738_v61 = vsub.f32 1.0, %v3385_v13  ;;  %v740_v4 = vmul.f32 %v3385_v13, %v3766_v51  ;;  %v3306_v51 = vld [vmem:[#allocation10 + $0x8] ss:$12 sps:$4 sm:$0xff]  }
 0x180   :  { %v736_v58 = vadd.f32 %v735_v56, %v404_v38 }
 0x182   :  { %3386 = vtanh.f32 %v736_v58 }
 0x18c   :  { %v3387_v63 = vpop.eup %3386 }
 0x18d   :  { %v739_v62 = vmul.f32 %v3387_v63, %v738_v61 }
 0x18f   :  { %v3884_v2 = vadd.f32 %v740_v4, %v739_v62 }
 0x191   :  { %v748_v20 = vpack.c.bf16 %v3884_v2, %v3884_v2 }
 0x193   :  { %749 = vst [vmem:[#allocation12] sm:$0xf] %v748_v20  ;;  %943 = vmatmul.mubr.bf16.vlgmr.msra.gmra.mrb[20].mxu0 %v748_v20  ;;  %3094 = vmatmul.mubr.bf16.vlgmr.msra.gmra.mrb[12].mxu1 %v748_v20 }
 0x194   :  { %1186 = vmatpush1.bf16.msra.mxu0 %v3714_v26  ;;  %1217 = vmatprep.mubr.bf16.mxu0 %v4197_v0 }
 0x195   :  { %1187 = vmatprep.subr.bf16.mxu0 %v3717_v27  ;;  %3113 = vmatprep.mubr.msk.bf16.mxu1 %vm3610_vm0, %v4198_v15 }
 0x196   :  { %3098 = vmatpush3.bf16.msra.mxu1 %v3306_v51 }
 0x197   :  { %3099 = vmatprep.subr.bf16.mxu1 %v4198_v15 }
 0x198   :  { %1188 = vmatpush1.bf16.msra.mxu0 %v3720_v29 }
 0x199   :  { %1189 = vmatprep.subr.bf16.mxu0 %v3724_v30 }
 0x19a   :  { %3100 = vmatpush3.bf16.msra.mxu1 %v3307_v28 }
 0x19b   :  { %3101 = vmatprep.subr.bf16.mxu1 %v4198_v15 }
 0x19c   :  { %1190 = vmatpush1.bf16.msra.mxu0 %v3727_v32 }
 0x19d   :  { %1191 = vmatprep.subr.bf16.mxu0 %v3730_v33 }
 0x19e   :  { %3102 = vmatpush3.bf16.msra.mxu1 %v3308_v12 }
 0x19f   :  { %3103 = vmatprep.subr.bf16.mxu1 %v4198_v15 }
 0x1a0   :  { %1192 = vmatpush1.bf16.msra.mxu0 %v3732_v34 }
 0x1a1   :  { %1193 = vmatprep.subr.bf16.mxu0 %v3734_v37 }
 0x1a2   :  { %3104 = vmatpush3.bf16.msra.mxu1 %v3309_v18 }
 0x1a3   :  { %3105 = vmatprep.subr.bf16.mxu1 %v4198_v15 }
 0x1a4   :  { %1194 = vmatpush1.bf16.msra.mxu0 %v3740_v40 }
 0x1a5   :  { %1195 = vmatprep.subr.bf16.mxu0 %v3742_v41 }
 0x1a6   :  { %3106 = vmatpush3.bf16.msra.mxu1 %v3310_v23 }
 0x1a7   :  { %3107 = vmatprep.subr.bf16.mxu1 %v4198_v15 }
 0x1a8   :  { %1196 = vmatpush1.bf16.msra.mxu0 %v3747_v44 }
 0x1a9   :  { %1197 = vmatprep.subr.bf16.mxu0 %v3749_v45 }
 0x1aa   :  { %3108 = vmatpush3.bf16.msra.mxu1 %v3311_v3 }
 0x1ab   :  { %3109 = vmatprep.subr.bf16.mxu1 %v4198_v15 }
 0x1ac   :  { %1198 = vmatpush1.bf16.msra.mxu0 %v3755_v47 }
 0x1ad   :  { %1199 = vmatprep.subr.bf16.mxu0 %v3759_v48 }
 0x1b0   :  { %1200 = vmatpush1.bf16.msra.mxu0 %v3764_v50 }
 0x1b1   :  { %1460 = vmatprep.subr.bf16.mxu0 %v3712_v24  ;;  %v3312_v24 = vld [vmem:[#allocation10 + $0x98] ss:$12 sps:$4 sm:$0xff]  }
 0x1b2   :  { %3110 = vmatpush3.bf16.msra.mxu1 %v3312_v24 }
 0x1b3   :  { %3111 = vmatprep.subr.bf16.mxu1 %v4198_v15 }
 0x1b6   :  { %3112 = vmatpush3.bf16.msra.mxu1 %v3313_v5 }
 0x1b7   :  { %3117 = vmatprep.subr.bf16.mxu1 %v4198_v15 }
 0x266   :  { %v944_v6 = vpop.f32.mrb[20].mxu0  ;;  %v985_v7 = vpop.f32.mrb[12].mxu1 }
 0x267   :  { %v945_v9 = vadd.f32 %v944_v6, %v3871_v39  ;;  %v946_v49 = vpop.f32.mrb[21].mxu0  ;;  %v3095_v53 = vpop.f32.mrb[13].mxu1  ;;  %v986_v18 = vadd.f32 %v985_v7, %v3879_v8 }
 0x268   :  { %v947_v54 = vadd.f32 %v946_v49, %v3873_v43  ;;  %v948_v38 = vpop.f32.mrb[22].mxu0  ;;  %v988_v56 = vpop.f32.mrb[14].mxu1 }
 0x269   :  { %v995_v58 = vadd.f32 %v945_v9, %v3814_v11  ;;  %v949_v13 = vpop.f32.mrb[23].mxu0  ;;  %v3096_v61 = vpop.f32.mrb[15].mxu1 }
 0x26a   :  { %v1002_v63 = vadd.f32 %v947_v54, %v3817_v14 }
 0x26b   :  { %v2791_v62 = vmul.f32 -1.442695, %v995_v58 }
 0x26c   :  { %v2792_v4 = vmul.f32 -1.442695, %v1002_v63 }
 0x26d   :  { %3388 = vpow2.f32 %v2791_v62 }
 0x26e   :  { %3390 = vpow2.f32 %v2792_v4 }
 0x277   :  { %v3389_v20 = vpop.eup %3388 }
 0x278   :  { %v999_v51 = vadd.f32 1.0, %v3389_v20  ;;  %v3391_v28 = vpop.eup %3390 }
 0x279   :  { %v1006_v12 = vadd.f32 1.0, %v3391_v28 }
 0x27a   :  { %3392 = vrcp.f32 %v999_v51 }
 0x27b   :  { %3394 = vrcp.f32 %v1006_v12 }
 0x284   :  { %v3393_v23 = vpop.eup %3392 }
 0x285   :  { %v1009_v3 = vmul.f32 %v3393_v23, %v986_v18  ;;  %v3395_v24 = vpop.eup %3394 }
 0x286   :  { %v1012_v5 = vsub.f32 1.0, %v3395_v24  ;;  %v1014_v9 = vmul.f32 %v3395_v24, %v3884_v2  ;;  %v3968_v24 = vld [vmem:[#allocation10] ss:$12 sps:$4 sm:$0xff]  }
 0x287   :  { %v1010_v11 = vadd.f32 %v1009_v3, %v3838_v42 }
 0x289   :  { %3396 = vtanh.f32 %v1010_v11 }
 0x293   :  { %v3397_v14 = vpop.eup %3396 }
 0x294   :  { %v1013_v6 = vmul.f32 %v3397_v14, %v1012_v5  ;;  %v3325_v5 = vld [vmem:[#allocation10 + $0x8] ss:$12 sps:$4 sm:$0xff]  }
 0x295   :  { %v3972_v14 = vld [vmem:[#allocation10 + $0x1c] ss:$12 sps:$4 sm:$0xff]  }
 0x296   :  { %v3922_v49 = vadd.f32 %v1014_v9, %v1013_v6  ;;  %v3975_v6 = vld [vmem:[#allocation10 + $0x18] ss:$12 sps:$4 sm:$0xff]   ;;  %v3329_v9 = vld [vmem:[#allocation10 + $0x20] ss:$12 sps:$4 sm:$0xff]  }
 0x298   :  { %v1022_v53 = vpack.c.bf16 %v3922_v49, %v3922_v49 }
 0x29a   :  { %1024 = vst [vmem:[#allocation12 + $0x4] sm:$0xf] %v1022_v53  ;;  %1218 = vmatmul.mubr.bf16.vlgmr.msra.gmra.mrb[24].mxu0 %v1022_v53  ;;  %3114 = vmatmul.mubr.bf16.vlgmr.msra.gmra.mrb[16].mxu1 %v1022_v53  ;;  %v3982_v53 = vld [vmem:[#allocation10 + $0x30] ss:$12 sps:$4 sm:$0xff]  }
 0x29b   :  { %1461 = vmatpush1.bf16.msra.mxu0 %v3714_v26  ;;  %1492 = vmatprep.mubr.bf16.mxu0 %v4197_v0  ;;  %v3314_v26 = vld [vmem:[#allocation10 + $0x8] ss:$12 sps:$4 sm:$0xff]  }
 0x29c   :  { %1462 = vmatprep.subr.bf16.mxu0 %v3717_v27  ;;  %3133 = vmatprep.mubr.msk.bf16.mxu1 %vm3610_vm0, %v4198_v15  ;;  %v3315_v27 = vld [vmem:[#allocation10 + $0x20] ss:$12 sps:$4 sm:$0xff]  }
 0x29d   :  { %3118 = vmatpush3.bf16.msra.mxu1 %v3314_v26  ;;  %v3333_v26 = vld [vmem:[#allocation10 + $0x38] ss:$12 sps:$4 sm:$0xff]  }
 0x29e   :  { %3119 = vmatprep.subr.bf16.mxu1 %v4198_v15 }
 0x29f   :  { %1463 = vmatpush1.bf16.msra.mxu0 %v3720_v29  ;;  %v3316_v29 = vld [vmem:[#allocation10 + $0x38] ss:$12 sps:$4 sm:$0xff]  }
 0x2a0   :  { %1464 = vmatprep.subr.bf16.mxu0 %v3724_v30  ;;  %v3317_v30 = vld [vmem:[#allocation10 + $0x50] ss:$12 sps:$4 sm:$0xff]  }
 0x2a1   :  { %3120 = vmatpush3.bf16.msra.mxu1 %v3315_v27  ;;  %v3986_v27 = vld [vmem:[#allocation10 + $0x4c] ss:$12 sps:$4 sm:$0xff]  }
 0x2a2   :  { %3121 = vmatprep.subr.bf16.mxu1 %v4198_v15 }
 0x2a3   :  { %1465 = vmatpush1.bf16.msra.mxu0 %v3727_v32  ;;  %v3318_v32 = vld [vmem:[#allocation10 + $0x68] ss:$12 sps:$4 sm:$0xff]  }
 0x2a4   :  { %1466 = vmatprep.subr.bf16.mxu0 %v3730_v33  ;;  %v3319_v33 = vld [vmem:[#allocation10 + $0x80] ss:$12 sps:$4 sm:$0xff]  }
 0x2a5   :  { %3122 = vmatpush3.bf16.msra.mxu1 %v3316_v29  ;;  %v3989_v29 = vld [vmem:[#allocation10 + $0x48] ss:$12 sps:$4 sm:$0xff]  }
 0x2a6   :  { %3123 = vmatprep.subr.bf16.mxu1 %v4198_v15 }
 0x2a7   :  { %1467 = vmatpush1.bf16.msra.mxu0 %v3732_v34  ;;  %v3320_v34 = vld [vmem:[#allocation10 + $0x98] ss:$12 sps:$4 sm:$0xff]  }
 0x2a8   :  { %1468 = vmatprep.subr.bf16.mxu0 %v3734_v37  ;;  %v3321_v37 = vld [vmem:[#allocation10 + $0xb0] ss:$12 sps:$4 sm:$0xff]  }
 0x2a9   :  { %3124 = vmatpush3.bf16.msra.mxu1 %v3317_v30  ;;  %v3337_v30 = vld [vmem:[#allocation10 + $0x50] ss:$12 sps:$4 sm:$0xff]  }
 0x2aa   :  { %3125 = vmatprep.subr.bf16.mxu1 %v4198_v15 }
 0x2ab   :  { %1469 = vmatpush1.bf16.msra.mxu0 %v3740_v40 }
 0x2ac   :  { %1470 = vmatprep.subr.bf16.mxu0 %v3742_v41 }
 0x2ad   :  { %3126 = vmatpush3.bf16.msra.mxu1 %v3318_v32  ;;  %v3993_v32 = vld [vmem:[#allocation10 + $0x64] ss:$12 sps:$4 sm:$0xff]  }
 0x2ae   :  { %3127 = vmatprep.subr.bf16.mxu1 %v4198_v15 }
 0x2af   :  { %1471 = vmatpush1.bf16.msra.mxu0 %v3747_v44 }
 0x2b0   :  { %1472 = vmatprep.subr.bf16.mxu0 %v3749_v45 }
 0x2b1   :  { %3128 = vmatpush3.bf16.msra.mxu1 %v3319_v33  ;;  %v3996_v33 = vld [vmem:[#allocation10 + $0x60] ss:$12 sps:$4 sm:$0xff]  }
 0x2b2   :  { %3129 = vmatprep.subr.bf16.mxu1 %v4198_v15 }
 0x2b3   :  { %1473 = vmatpush1.bf16.msra.mxu0 %v3755_v47 }
 0x2b4   :  { %1474 = vmatprep.subr.bf16.mxu0 %v3759_v48 }
 0x2b5   :  { %3130 = vmatpush3.bf16.msra.mxu1 %v3320_v34  ;;  %v3341_v34 = vld [vmem:[#allocation10 + $0x68] ss:$12 sps:$4 sm:$0xff]  }
 0x2b6   :  { %3131 = vmatprep.subr.bf16.mxu1 %v4198_v15 }
 0x2b7   :  { %1475 = vmatpush1.bf16.msra.mxu0 %v3764_v50 }
 0x2b9   :  { %3132 = vmatpush3.bf16.msra.mxu1 %v3321_v37  ;;  %v3999_v37 = vld [vmem:[#allocation10 + $0x7c] ss:$12 sps:$4 sm:$0xff]  }
 0x2ba   :  { %3137 = vmatprep.subr.bf16.mxu1 %v4198_v15 }
 0x36d   :  { %v1219_v40 = vpop.f32.mrb[24].mxu0  ;;  %v1260_v41 = vpop.f32.mrb[16].mxu1 }
 0x36e   :  { %v1220_v44 = vadd.f32 %v1219_v40, %v3871_v39  ;;  %v1221_v45 = vpop.f32.mrb[25].mxu0  ;;  %v3115_v47 = vpop.f32.mrb[17].mxu1  ;;  %v1261_v4 = vadd.f32 %v1260_v41, %v3879_v8  ;;  %v4002_v40 = vld [vmem:[#allocation10 + $0x78] ss:$12 sps:$4 sm:$0xff]   ;;  %v3345_v41 = vld [vmem:[#allocation10 + $0x80] ss:$12 sps:$4 sm:$0xff]  }
 0x36f   :  { %v1222_v48 = vadd.f32 %v1221_v45, %v3873_v43  ;;  %v1223_v50 = vpop.f32.mrb[26].mxu0  ;;  %v1263_v42 = vpop.f32.mrb[18].mxu1  ;;  %v4009_v45 = vld [vmem:[#allocation10 + $0x90] ss:$12 sps:$4 sm:$0xff]   ;;  %v3349_v47 = vld [vmem:[#allocation10 + $0x98] ss:$12 sps:$4 sm:$0xff]  }
 0x370   :  { %v1270_v2 = vadd.f32 %v1220_v44, %v3823_v17  ;;  %v1224_v7 = vpop.f32.mrb[27].mxu0  ;;  %v3116_v54 = vpop.f32.mrb[19].mxu1  ;;  %v4006_v44 = vld [vmem:[#allocation10 + $0x94] ss:$12 sps:$4 sm:$0xff]   ;;  %v3353_v42 = vld [vmem:[#allocation10 + $0xb0] ss:$12 sps:$4 sm:$0xff]  }
 0x371   :  { %v1277_v38 = vadd.f32 %v1222_v48, %v3825_v19  ;;  %v4013_v48 = vld [vmem:[#allocation10 + $0xac] ss:$12 sps:$4 sm:$0xff]   ;;  %v4016_v50 = vld [vmem:[#allocation10 + $0xa8] ss:$12 sps:$4 sm:$0xff]  }
 0x372   :  { %v2817_v56 = vmul.f32 -1.442695, %v1270_v2 }
 0x373   :  { %v2818_v58 = vmul.f32 -1.442695, %v1277_v38 }
 0x374   :  { %3398 = vpow2.f32 %v2817_v56 }
 0x375   :  { %3400 = vpow2.f32 %v2818_v58 }
 0x37e   :  { %v3399_v13 = vpop.eup %3398 }
 0x37f   :  { %v1274_v61 = vadd.f32 1.0, %v3399_v13  ;;  %v3401_v63 = vpop.eup %3400 }
 0x380   :  { %v1281_v62 = vadd.f32 1.0, %v3401_v63 }
 0x381   :  { %3402 = vrcp.f32 %v1274_v61 }
 0x382   :  { %3404 = vrcp.f32 %v1281_v62 }
 0x38b   :  { %v3403_v20 = vpop.eup %3402 }
 0x38c   :  { %v1284_v51 = vmul.f32 %v3403_v20, %v1261_v4  ;;  %v3405_v28 = vpop.eup %3404 }
 0x38d   :  { %v1287_v12 = vsub.f32 1.0, %v3405_v28  ;;  %v1289_v23 = vmul.f32 %v3405_v28, %v3922_v49  ;;  %v3979_v49 = vld [vmem:[#allocation10 + $0x34] ss:$12 sps:$4 sm:$0xff]  }
 0x38e   :  { %v1285_v17 = vadd.f32 %v1284_v51, %v3830_v25  ;;  %v3966_v25 = vld [vmem:[#allocation10 + $0x4] ss:$12 sps:$4 sm:$0xff]  }
 0x38f   :  { %1735 = vmatprep.subr.bf16.mxu0 %v3966_v25 }
 0x390   :  { %3406 = vtanh.f32 %v1285_v17 }
 0x39a   :  { %v3407_v19 = vpop.eup %3406 }
 0x39b   :  { %v1288_v18 = vmul.f32 %v3407_v19, %v1287_v12 }
 0x39d   :  { %v3959_v3 = vadd.f32 %v1289_v23, %v1288_v18 }
 0x39f   :  { %v1297_v11 = vpack.c.bf16 %v3959_v3, %v3959_v3 }
 0x3a1   :  { %1299 = vst [vmem:[#allocation12 + $0x8] sm:$0xf] %v1297_v11  ;;  %1493 = vmatmul.mubr.bf16.vlgmr.msra.gmra.mrb[28].mxu0 %v1297_v11  ;;  %3134 = vmatmul.mubr.bf16.vlgmr.msra.gmra.mrb[20].mxu1 %v1297_v11 }
 0x3a2   :  { %1767 = vmatprep.mubr.bf16.mxu0 %v4197_v0  ;;  %3153 = vmatprep.mubr.msk.bf16.mxu1 %vm3610_vm0, %v4198_v15 }
 0x3a3   :  { %1736 = vmatpush1.bf16.msra.mxu0 %v3968_v24  ;;  %3138 = vmatpush3.bf16.msra.mxu1 %v3325_v5 }
 0x3a4   :  { %3139 = vmatprep.subr.bf16.mxu1 %v4198_v15  ;;  %1737 = vmatprep.subr.bf16.mxu0 %v3972_v14 }
 0x3a7   :  { %1738 = vmatpush1.bf16.msra.mxu0 %v3975_v6  ;;  %3140 = vmatpush3.bf16.msra.mxu1 %v3329_v9 }
 0x3a8   :  { %3141 = vmatprep.subr.bf16.mxu1 %v4198_v15  ;;  %1739 = vmatprep.subr.bf16.mxu0 %v3979_v49 }
 0x3ab   :  { %1740 = vmatpush1.bf16.msra.mxu0 %v3982_v53  ;;  %3142 = vmatpush3.bf16.msra.mxu1 %v3333_v26 }
 0x3ac   :  { %3143 = vmatprep.subr.bf16.mxu1 %v4198_v15  ;;  %1741 = vmatprep.subr.bf16.mxu0 %v3986_v27 }
 0x3af   :  { %1742 = vmatpush1.bf16.msra.mxu0 %v3989_v29  ;;  %3144 = vmatpush3.bf16.msra.mxu1 %v3337_v30 }
 0x3b0   :  { %3145 = vmatprep.subr.bf16.mxu1 %v4198_v15  ;;  %1743 = vmatprep.subr.bf16.mxu0 %v3993_v32 }
 0x3b3   :  { %1744 = vmatpush1.bf16.msra.mxu0 %v3996_v33  ;;  %3146 = vmatpush3.bf16.msra.mxu1 %v3341_v34 }
 0x3b4   :  { %1745 = vmatprep.subr.bf16.mxu0 %v3999_v37  ;;  %3147 = vmatprep.subr.bf16.mxu1 %v4198_v15 }
 0x3b7   :  { %1746 = vmatpush1.bf16.msra.mxu0 %v4002_v40  ;;  %3148 = vmatpush3.bf16.msra.mxu1 %v3345_v41 }
 0x3b8   :  { %1747 = vmatprep.subr.bf16.mxu0 %v4006_v44  ;;  %3149 = vmatprep.subr.bf16.mxu1 %v4198_v15 }
 0x3bb   :  { %1748 = vmatpush1.bf16.msra.mxu0 %v4009_v45  ;;  %3150 = vmatpush3.bf16.msra.mxu1 %v3349_v47 }
 0x3bc   :  { %1749 = vmatprep.subr.bf16.mxu0 %v4013_v48  ;;  %3151 = vmatprep.subr.bf16.mxu1 %v4198_v15 }
 0x3bf   :  { %1750 = vmatpush1.bf16.msra.mxu0 %v4016_v50  ;;  %3152 = vmatpush3.bf16.msra.mxu1 %v3353_v42  ;;  %v3356_v42 = vld [vmem:[#allocation10 + $0x38] ss:$12 sps:$4 sm:$0xff]  }
 0x3c0   :  { %2010 = vmatprep.subr.bf16.mxu0 %v3966_v25  ;;  %3157 = vmatprep.subr.bf16.mxu1 %v4198_v15 }
 0x474   :  { %v1494_v2 = vpop.f32.mrb[28].mxu0  ;;  %v1535_v7 = vpop.f32.mrb[20].mxu1 }
 0x475   :  { %v1495_v54 = vadd.f32 %v1494_v2, %v3871_v39  ;;  %v1496_v38 = vpop.f32.mrb[29].mxu0  ;;  %v3135_v56 = vpop.f32.mrb[21].mxu1  ;;  %v1536_v23 = vadd.f32 %v1535_v7, %v3879_v8  ;;  %v3357_v2 = vld [vmem:[#allocation10 + $0x50] ss:$12 sps:$4 sm:$0xff]   ;;  %v3358_v7 = vld [vmem:[#allocation10 + $0x68] ss:$12 sps:$4 sm:$0xff]  }
 0x476   :  { %v1497_v58 = vadd.f32 %v1496_v38, %v3873_v43  ;;  %v1498_v13 = vpop.f32.mrb[30].mxu0  ;;  %v1538_v61 = vpop.f32.mrb[22].mxu1  ;;  %v3360_v38 = vld [vmem:[#allocation10 + $0x98] ss:$12 sps:$4 sm:$0xff]   ;;  %v3361_v56 = vld [vmem:[#allocation10 + $0xb0] ss:$12 sps:$4 sm:$0xff]  }
 0x477   :  { %v1545_v63 = vadd.f32 %v1495_v54, %v3827_v22  ;;  %v1499_v62 = vpop.f32.mrb[31].mxu0  ;;  %v3136_v4 = vpop.f32.mrb[23].mxu1  ;;  %v3359_v54 = vld [vmem:[#allocation10 + $0x80] ss:$12 sps:$4 sm:$0xff]  }
 0x478   :  { %v1552_v20 = vadd.f32 %v1497_v58, %v3832_v31 }
 0x479   :  { %v2843_v51 = vmul.f32 -1.442695, %v1545_v63 }
 0x47a   :  { %v2844_v17 = vmul.f32 -1.442695, %v1552_v20 }
 0x47b   :  { %3408 = vpow2.f32 %v2843_v51 }
 0x47c   :  { %3410 = vpow2.f32 %v2844_v17 }
 0x485   :  { %v3409_v28 = vpop.eup %3408 }
 0x486   :  { %v1549_v12 = vadd.f32 1.0, %v3409_v28  ;;  %v3411_v19 = vpop.eup %3410 }
 0x487   :  { %v1556_v18 = vadd.f32 1.0, %v3411_v19 }
 0x488   :  { %3412 = vrcp.f32 %v1549_v12 }
 0x489   :  { %3414 = vrcp.f32 %v1556_v18 }
 0x492   :  { %v3413_v11 = vpop.eup %3412 }
 0x493   :  { %v1559_v5 = vmul.f32 %v3413_v11, %v1536_v23  ;;  %v3415_v9 = vpop.eup %3414 }
 0x494   :  { %v1562_v26 = vsub.f32 1.0, %v3415_v9  ;;  %v1564_v34 = vmul.f32 %v3415_v9, %v3959_v3  ;;  %v3355_v3 = vld [vmem:[#allocation10 + $0x20] ss:$12 sps:$4 sm:$0xff]  }
 0x495   :  { %v1560_v22 = vadd.f32 %v1559_v5, %v3835_v36  ;;  %v3354_v36 = vld [vmem:[#allocation10 + $0x8] ss:$12 sps:$4 sm:$0xff]  }
 0x497   :  { %3416 = vtanh.f32 %v1560_v22 }
 0x4a1   :  { %v3417_v31 = vpop.eup %3416 }
 0x4a2   :  { %v1563_v30 = vmul.f32 %v3417_v31, %v1562_v26 }
 0x4a4   :  { %v4030_v41 = vadd.f32 %v1564_v34, %v1563_v30 }
 0x4a6   :  { %v1572_v47 = vpack.c.bf16 %v4030_v41, %v4030_v41 }
 0x4a8   :  { %1574 = vst [vmem:[#allocation12 + $0xc] sm:$0xf] %v1572_v47  ;;  %1768 = vmatmul.mubr.bf16.vlgmr.msra.gmra.mrb[32].mxu0 %v1572_v47  ;;  %3154 = vmatmul.mubr.bf16.vlgmr.msra.gmra.mrb[24].mxu1 %v1572_v47 }
 0x4a9   :  { %2011 = vmatpush1.bf16.msra.mxu0 %v3968_v24  ;;  %2042 = vmatprep.mubr.bf16.mxu0 %v4197_v0 }
 0x4aa   :  { %2012 = vmatprep.subr.bf16.mxu0 %v3972_v14  ;;  %3173 = vmatprep.mubr.msk.bf16.mxu1 %vm3610_vm0, %v4198_v15 }
 0x4ab   :  { %3158 = vmatpush3.bf16.msra.mxu1 %v3354_v36 }
 0x4ac   :  { %3159 = vmatprep.subr.bf16.mxu1 %v4198_v15 }
 0x4ad   :  { %2013 = vmatpush1.bf16.msra.mxu0 %v3975_v6 }
 0x4ae   :  { %2014 = vmatprep.subr.bf16.mxu0 %v3979_v49 }
 0x4af   :  { %3160 = vmatpush3.bf16.msra.mxu1 %v3355_v3 }
 0x4b0   :  { %3161 = vmatprep.subr.bf16.mxu1 %v4198_v15 }
 0x4b1   :  { %2015 = vmatpush1.bf16.msra.mxu0 %v3982_v53 }
 0x4b2   :  { %2016 = vmatprep.subr.bf16.mxu0 %v3986_v27 }
 0x4b3   :  { %3162 = vmatpush3.bf16.msra.mxu1 %v3356_v42 }
 0x4b4   :  { %3163 = vmatprep.subr.bf16.mxu1 %v4198_v15 }
 0x4b5   :  { %2017 = vmatpush1.bf16.msra.mxu0 %v3989_v29 }
 0x4b6   :  { %2018 = vmatprep.subr.bf16.mxu0 %v3993_v32 }
 0x4b7   :  { %3164 = vmatpush3.bf16.msra.mxu1 %v3357_v2 }
 0x4b8   :  { %3165 = vmatprep.subr.bf16.mxu1 %v4198_v15 }
 0x4b9   :  { %2019 = vmatpush1.bf16.msra.mxu0 %v3996_v33 }
 0x4ba   :  { %2020 = vmatprep.subr.bf16.mxu0 %v3999_v37 }
 0x4bb   :  { %3166 = vmatpush3.bf16.msra.mxu1 %v3358_v7  ;;  %v3364_v7 = vld [vmem:[#allocation10 + $0x38] ss:$12 sps:$4 sm:$0xff]  }
 0x4bc   :  { %3167 = vmatprep.subr.bf16.mxu1 %v4198_v15 }
 0x4bd   :  { %2021 = vmatpush1.bf16.msra.mxu0 %v4002_v40 }
 0x4be   :  { %2022 = vmatprep.subr.bf16.mxu0 %v4006_v44 }
 0x4bf   :  { %3168 = vmatpush3.bf16.msra.mxu1 %v3359_v54  ;;  %v3365_v54 = vld [vmem:[#allocation10 + $0x50] ss:$12 sps:$4 sm:$0xff]  }
 0x4c0   :  { %3169 = vmatprep.subr.bf16.mxu1 %v4198_v15 }
 0x4c1   :  { %2023 = vmatpush1.bf16.msra.mxu0 %v4009_v45 }
 0x4c2   :  { %2024 = vmatprep.subr.bf16.mxu0 %v4013_v48 }
 0x4c3   :  { %3170 = vmatpush3.bf16.msra.mxu1 %v3360_v38  ;;  %v3366_v38 = vld [vmem:[#allocation10 + $0x68] ss:$12 sps:$4 sm:$0xff]  }
 0x4c4   :  { %3171 = vmatprep.subr.bf16.mxu1 %v4198_v15 }
 0x4c5   :  { %2025 = vmatpush1.bf16.msra.mxu0 %v4016_v50 }
 0x4c6   :  { %2285 = vmatprep.subr.bf16.mxu0 %v3966_v25 }
 0x4c7   :  { %3172 = vmatpush3.bf16.msra.mxu1 %v3361_v56  ;;  %v3367_v56 = vld [vmem:[#allocation10 + $0x80] ss:$12 sps:$4 sm:$0xff]  }
 0x4c8   :  { %3177 = vmatprep.subr.bf16.mxu1 %v4198_v15 }
 0x57b   :  { %v1769_v58 = vpop.f32.mrb[32].mxu0  ;;  %v1810_v13 = vpop.f32.mrb[24].mxu1 }
 0x57c   :  { %v1770_v61 = vadd.f32 %v1769_v58, %v3871_v39  ;;  %v1771_v63 = vpop.f32.mrb[33].mxu0  ;;  %v3155_v62 = vpop.f32.mrb[25].mxu1  ;;  %v1811_v26 = vadd.f32 %v1810_v13, %v3879_v8  ;;  %v3369_v58 = vld [vmem:[#allocation10 + $0xb0] ss:$12 sps:$4 sm:$0xff]  }
 0x57d   :  { %v1772_v4 = vadd.f32 %v1771_v63, %v3873_v43  ;;  %v1773_v20 = vpop.f32.mrb[34].mxu0  ;;  %v1813_v51 = vpop.f32.mrb[26].mxu1 }
 0x57e   :  { %v1820_v17 = vadd.f32 %v1770_v61, %v3840_v46  ;;  %v1774_v28 = vpop.f32.mrb[35].mxu0  ;;  %v3156_v12 = vpop.f32.mrb[27].mxu1 }
 0x57f   :  { %v1827_v19 = vadd.f32 %v1772_v4, %v3842_v52 }
 0x580   :  { %v2869_v18 = vmul.f32 -1.442695, %v1820_v17 }
 0x581   :  { %v2870_v23 = vmul.f32 -1.442695, %v1827_v19 }
 0x582   :  { %3418 = vpow2.f32 %v2869_v18 }
 0x583   :  { %3420 = vpow2.f32 %v2870_v23 }
 0x58c   :  { %v3419_v11 = vpop.eup %3418 }
 0x58d   :  { %v1824_v5 = vadd.f32 1.0, %v3419_v11  ;;  %v3421_v22 = vpop.eup %3420 }
 0x58e   :  { %v1831_v9 = vadd.f32 1.0, %v3421_v22 }
 0x58f   :  { %3422 = vrcp.f32 %v1824_v5 }
 0x590   :  { %3424 = vrcp.f32 %v1831_v9 }
 0x599   :  { %v3423_v31 = vpop.eup %3422 }
 0x59a   :  { %v1834_v30 = vmul.f32 %v3423_v31, %v1811_v26  ;;  %v3425_v34 = vpop.eup %3424 }
 0x59b   :  { %v1837_v47 = vsub.f32 1.0, %v3425_v34  ;;  %v1839_v3 = vmul.f32 %v3425_v34, %v4030_v41  ;;  %v3363_v41 = vld [vmem:[#allocation10 + $0x20] ss:$12 sps:$4 sm:$0xff]  }
 0x59c   :  { %v1835_v46 = vadd.f32 %v1834_v30, %v3852_v60  ;;  %v3362_v60 = vld [vmem:[#allocation10 + $0x8] ss:$12 sps:$4 sm:$0xff]  }
 0x59e   :  { %3426 = vtanh.f32 %v1835_v46 }
 0x5a8   :  { %v3427_v52 = vpop.eup %3426 }
 0x5a9   :  { %v1838_v36 = vmul.f32 %v3427_v52, %v1837_v47 }
 0x5ab   :  { %v4068_v42 = vadd.f32 %v1839_v3, %v1838_v36 }
 0x5ad   :  { %v1847_v2 = vpack.c.bf16 %v4068_v42, %v4068_v42 }
 0x5af   :  { %1849 = vst [vmem:[#allocation12 + $0x10] sm:$0xf] %v1847_v2  ;;  %2043 = vmatmul.mubr.bf16.vlgmr.msra.gmra.mrb[36].mxu0 %v1847_v2  ;;  %3174 = vmatmul.mubr.bf16.vlgmr.msra.gmra.mrb[28].mxu1 %v1847_v2 }
 0x5b0   :  { %2286 = vmatpush1.bf16.msra.mxu0 %v3968_v24  ;;  %2317 = vmatprep.mubr.bf16.mxu0 %v4197_v0 }
 0x5b1   :  { %2287 = vmatprep.subr.bf16.mxu0 %v3972_v14  ;;  %3193 = vmatprep.mubr.msk.bf16.mxu1 %vm3610_vm0, %v4198_v15 }
 0x5b2   :  { %3178 = vmatpush3.bf16.msra.mxu1 %v3362_v60 }
 0x5b3   :  { %3179 = vmatprep.subr.bf16.mxu1 %v4198_v15 }
 0x5b4   :  { %2288 = vmatpush1.bf16.msra.mxu0 %v3975_v6 }
 0x5b5   :  { %2289 = vmatprep.subr.bf16.mxu0 %v3979_v49 }
 0x5b6   :  { %3180 = vmatpush3.bf16.msra.mxu1 %v3363_v41 }
 0x5b7   :  { %3181 = vmatprep.subr.bf16.mxu1 %v4198_v15 }
 0x5b8   :  { %2290 = vmatpush1.bf16.msra.mxu0 %v3982_v53 }
 0x5b9   :  { %2291 = vmatprep.subr.bf16.mxu0 %v3986_v27 }
 0x5ba   :  { %3182 = vmatpush3.bf16.msra.mxu1 %v3364_v7 }
 0x5bb   :  { %3183 = vmatprep.subr.bf16.mxu1 %v4198_v15 }
 0x5bc   :  { %2292 = vmatpush1.bf16.msra.mxu0 %v3989_v29 }
 0x5bd   :  { %2293 = vmatprep.subr.bf16.mxu0 %v3993_v32 }
 0x5be   :  { %3184 = vmatpush3.bf16.msra.mxu1 %v3365_v54 }
 0x5bf   :  { %3185 = vmatprep.subr.bf16.mxu1 %v4198_v15 }
 0x5c0   :  { %2294 = vmatpush1.bf16.msra.mxu0 %v3996_v33 }
 0x5c1   :  { %2295 = vmatprep.subr.bf16.mxu0 %v3999_v37 }
 0x5c2   :  { %3186 = vmatpush3.bf16.msra.mxu1 %v3366_v38 }
 0x5c3   :  { %3187 = vmatprep.subr.bf16.mxu1 %v4198_v15 }
 0x5c4   :  { %2296 = vmatpush1.bf16.msra.mxu0 %v4002_v40 }
 0x5c5   :  { %2297 = vmatprep.subr.bf16.mxu0 %v4006_v44 }
 0x5c6   :  { %3188 = vmatpush3.bf16.msra.mxu1 %v3367_v56 }
 0x5c7   :  { %3189 = vmatprep.subr.bf16.mxu1 %v4198_v15 }
 0x5c8   :  { %2298 = vmatpush1.bf16.msra.mxu0 %v4009_v45 }
 0x5c9   :  { %2299 = vmatprep.subr.bf16.mxu0 %v4013_v48 }
 0x5cc   :  { %2300 = vmatpush1.bf16.msra.mxu0 %v4016_v50 }
 0x5cd   :  { %2560 = vmatprep.subr.bf16.mxu0 %v3966_v25  ;;  %v3368_v25 = vld [vmem:[#allocation10 + $0x98] ss:$12 sps:$4 sm:$0xff]  }
 0x5ce   :  { %3190 = vmatpush3.bf16.msra.mxu1 %v3368_v25 }
 0x5cf   :  { %3191 = vmatprep.subr.bf16.mxu1 %v4198_v15 }
 0x5d2   :  { %3192 = vmatpush3.bf16.msra.mxu1 %v3369_v58 }
 0x5d3   :  { %3197 = vmatprep.subr.bf16.mxu1 %v4198_v15 }
 0x682   :  { %v2044_v13 = vpop.f32.mrb[36].mxu0  ;;  %v2085_v61 = vpop.f32.mrb[28].mxu1 }
 0x683   :  { %v2045_v63 = vadd.f32 %v2044_v13, %v3871_v39  ;;  %v2046_v62 = vpop.f32.mrb[37].mxu0  ;;  %v3175_v4 = vpop.f32.mrb[29].mxu1  ;;  %v2086_v31 = vadd.f32 %v2085_v61, %v3879_v8 }
 0x684   :  { %v2047_v20 = vadd.f32 %v2046_v62, %v3873_v43  ;;  %v2048_v51 = vpop.f32.mrb[38].mxu0  ;;  %v2088_v17 = vpop.f32.mrb[30].mxu1 }
 0x685   :  { %v2095_v28 = vadd.f32 %v2045_v63, %v3844_v55  ;;  %v2049_v12 = vpop.f32.mrb[39].mxu0  ;;  %v3176_v19 = vpop.f32.mrb[31].mxu1 }
 0x686   :  { %v2102_v18 = vadd.f32 %v2047_v20, %v3849_v59 }
 0x687   :  { %v2895_v23 = vmul.f32 -1.442695, %v2095_v28 }
 0x688   :  { %v2896_v11 = vmul.f32 -1.442695, %v2102_v18 }
 0x689   :  { %3428 = vpow2.f32 %v2895_v23 }
 0x68a   :  { %3430 = vpow2.f32 %v2896_v11 }
 0x693   :  { %v3429_v5 = vpop.eup %3428 }
 0x694   :  { %v2099_v22 = vadd.f32 1.0, %v3429_v5  ;;  %v3431_v9 = vpop.eup %3430 }
 0x695   :  { %v2106_v26 = vadd.f32 1.0, %v3431_v9 }
 0x696   :  { %3432 = vrcp.f32 %v2099_v22 }
 0x697   :  { %3434 = vrcp.f32 %v2106_v26 }
 0x6a0   :  { %v3433_v30 = vpop.eup %3432 }
 0x6a1   :  { %v2109_v46 = vmul.f32 %v3433_v30, %v2086_v31  ;;  %v3435_v34 = vpop.eup %3434 }
 0x6a2   :  { %v2112_v47 = vsub.f32 1.0, %v3435_v34  ;;  %v2114_v36 = vmul.f32 %v3435_v34, %v4068_v42 }
 0x6a3   :  { %v2110_v55 = vadd.f32 %v2109_v46, %v3858_v1  ;;  %v3370_v1 = vld [vmem:[#allocation10 + $0x8] ss:$12 sps:$4 sm:$0xff]  }
 0x6a5   :  { %3436 = vtanh.f32 %v2110_v55 }
 0x6af   :  { %v3437_v59 = vpop.eup %3436 }
 0x6b0   :  { %v2113_v52 = vmul.f32 %v3437_v59, %v2112_v47 }
 0x6b2   :  { %v4106_v3 = vadd.f32 %v2114_v36, %v2113_v52  ;;  %v4199_v36 = vld [vmem:[#allocation20_spill] sm:$0xff] }
 0x6b4   :  { %v2122_v2 = vpack.c.bf16 %v4106_v3, %v4106_v3 }
 0x6b6   :  { %2124 = vst [vmem:[#allocation12 + $0x14] sm:$0xf] %v2122_v2  ;;  %2318 = vmatmul.mubr.bf16.vlgmr.msra.gmra.mrb[40].mxu0 %v2122_v2  ;;  %3194 = vmatmul.mubr.bf16.vlgmr.msra.gmra.mrb[32].mxu1 %v2122_v2 }
 0x6b7   :  { %2561 = vmatpush1.bf16.msra.mxu0 %v3968_v24  ;;  %2592 = vmatprep.mubr.bf16.mxu0 %v4197_v0  ;;  %v3371_v0 = vld [vmem:[#allocation10 + $0x20] ss:$12 sps:$4 sm:$0xff]   ;;  %v3372_v24 = vld [vmem:[#allocation10 + $0x38] ss:$12 sps:$4 sm:$0xff]  }
 0x6b8   :  { %2562 = vmatprep.subr.bf16.mxu0 %v3972_v14  ;;  %3213 = vmatprep.mubr.msk.bf16.mxu1 %vm3610_vm0, %v4198_v15  ;;  %v3373_v14 = vld [vmem:[#allocation10 + $0x50] ss:$12 sps:$4 sm:$0xff]  }
 0x6b9   :  { %3198 = vmatpush3.bf16.msra.mxu1 %v3370_v1 }
 0x6ba   :  { %3199 = vmatprep.subr.bf16.mxu1 %v4198_v15 }
 0x6bb   :  { %2563 = vmatpush1.bf16.msra.mxu0 %v3975_v6  ;;  %v3374_v6 = vld [vmem:[#allocation10 + $0x68] ss:$12 sps:$4 sm:$0xff]  }
 0x6bc   :  { %2564 = vmatprep.subr.bf16.mxu0 %v3979_v49  ;;  %v3375_v49 = vld [vmem:[#allocation10 + $0x80] ss:$12 sps:$4 sm:$0xff]  }
 0x6bd   :  { %3200 = vmatpush3.bf16.msra.mxu1 %v3371_v0 }
 0x6be   :  { %3201 = vmatprep.subr.bf16.mxu1 %v4198_v15 }
 0x6bf   :  { %2565 = vmatpush1.bf16.msra.mxu0 %v3982_v53  ;;  %v3376_v53 = vld [vmem:[#allocation10 + $0x98] ss:$12 sps:$4 sm:$0xff]  }
 0x6c0   :  { %2566 = vmatprep.subr.bf16.mxu0 %v3986_v27  ;;  %v3377_v27 = vld [vmem:[#allocation10 + $0xb0] ss:$12 sps:$4 sm:$0xff]  }
 0x6c1   :  { %3202 = vmatpush3.bf16.msra.mxu1 %v3372_v24 }
 0x6c2   :  { %3203 = vmatprep.subr.bf16.mxu1 %v4198_v15 }
 0x6c3   :  { %2567 = vmatpush1.bf16.msra.mxu0 %v3989_v29 }
 0x6c4   :  { %2568 = vmatprep.subr.bf16.mxu0 %v3993_v32 }
 0x6c5   :  { %3204 = vmatpush3.bf16.msra.mxu1 %v3373_v14 }
 0x6c6   :  { %3205 = vmatprep.subr.bf16.mxu1 %v4198_v15 }
 0x6c7   :  { %2569 = vmatpush1.bf16.msra.mxu0 %v3996_v33 }
 0x6c8   :  { %2570 = vmatprep.subr.bf16.mxu0 %v3999_v37 }
 0x6c9   :  { %3206 = vmatpush3.bf16.msra.mxu1 %v3374_v6 }
 0x6ca   :  { %3207 = vmatprep.subr.bf16.mxu1 %v4198_v15 }
 0x6cb   :  { %2571 = vmatpush1.bf16.msra.mxu0 %v4002_v40 }
 0x6cc   :  { %2572 = vmatprep.subr.bf16.mxu0 %v4006_v44 }
 0x6cd   :  { %3208 = vmatpush3.bf16.msra.mxu1 %v3375_v49 }
 0x6ce   :  { %3209 = vmatprep.subr.bf16.mxu1 %v4198_v15 }
 0x6cf   :  { %2573 = vmatpush1.bf16.msra.mxu0 %v4009_v45 }
 0x6d0   :  { %2574 = vmatprep.subr.bf16.mxu0 %v4013_v48 }
 0x6d1   :  { %3210 = vmatpush3.bf16.msra.mxu1 %v3376_v53 }
 0x6d2   :  { %3211 = vmatprep.subr.bf16.mxu1 %v4198_v15 }
 0x6d3   :  { %2575 = vmatpush1.bf16.msra.mxu0 %v4016_v50 }
 0x6d5   :  { %3212 = vmatpush3.bf16.msra.mxu1 %v3377_v27 }
 0x789   :  { %v2319_v29 = vpop.f32.mrb[40].mxu0  ;;  %v2360_v32 = vpop.f32.mrb[32].mxu1 }
 0x78a   :  { %v2320_v33 = vadd.f32 %v2319_v29, %v3871_v39  ;;  %v2321_v37 = vpop.f32.mrb[41].mxu0  ;;  %v3195_v40 = vpop.f32.mrb[33].mxu1  ;;  %v2361_v58 = vadd.f32 %v2360_v32, %v3879_v8 }
 0x78b   :  { %v2322_v44 = vadd.f32 %v2321_v37, %v3873_v43  ;;  %v2323_v45 = vpop.f32.mrb[42].mxu0  ;;  %v2363_v48 = vpop.f32.mrb[34].mxu1 }
 0x78c   :  { %v2370_v50 = vadd.f32 %v2320_v33, %v3860_v10  ;;  %v2324_v42 = vpop.f32.mrb[43].mxu0  ;;  %v3196_v60 = vpop.f32.mrb[35].mxu1 }
 0x78d   :  { %v2377_v41 = vadd.f32 %v2322_v44, %v3862_v16 }
 0x78e   :  { %v2921_v7 = vmul.f32 -1.442695, %v2370_v50 }
 0x78f   :  { %v2922_v15 = vmul.f32 -1.442695, %v2377_v41 }
 0x790   :  { %3438 = vpow2.f32 %v2921_v7 }
 0x791   :  { %3440 = vpow2.f32 %v2922_v15 }
 0x79a   :  { %v3439_v54 = vpop.eup %3438 }
 0x79b   :  { %v2374_v38 = vadd.f32 1.0, %v3439_v54  ;;  %v3441_v56 = vpop.eup %3440 }
 0x79c   :  { %v2381_v25 = vadd.f32 1.0, %v3441_v56 }
 0x79d   :  { %3442 = vrcp.f32 %v2374_v38 }
 0x79e   :  { %3444 = vrcp.f32 %v2381_v25 }
 0x7a7   :  { %v3443_v13 = vpop.eup %3442 }
 0x7a8   :  { %v2384_v61 = vmul.f32 %v3443_v13, %v2361_v58  ;;  %v3445_v63 = vpop.eup %3444 }
 0x7a9   :  { %v2387_v62 = vsub.f32 1.0, %v3445_v63  ;;  %v2389_v20 = vmul.f32 %v3445_v63, %v4106_v3 }
 0x7aa   :  { %v2385_v10 = vadd.f32 %v2384_v61, %v3847_v57 }
 0x7ac   :  { %3446 = vtanh.f32 %v2385_v10 }
 0x7b6   :  { %v3447_v16 = vpop.eup %3446 }
 0x7b7   :  { %v2388_v4 = vmul.f32 %v3447_v16, %v2387_v62 }
 0x7b9   :  { %v2390_v51 = vadd.f32 %v2389_v20, %v2388_v4 }
 0x7bb   :  { %v2397_v17 = vpack.c.bf16 %v2390_v51, %v2390_v51 }
 0x7bd   :  { %2399 = vst [vmem:[#allocation12 + $0x18] sm:$0xf] %v2397_v17  ;;  %2593 = vmatmul.mubr.bf16.vlgmr.msra.gmra.mrb[44].mxu0 %v2397_v17  ;;  %3214 = vmatmul.mubr.bf16.vlgmr.msra.gmra.mrb[36].mxu1 %v2397_v17 }
 0x890   :  { %v2594_v28 = vpop.f32.mrb[44].mxu0  ;;  %v2635_v12 = vpop.f32.mrb[36].mxu1 }
 0x891   :  { %v2595_v19 = vadd.f32 %v2594_v28, %v3871_v39  ;;  %v2596_v18 = vpop.f32.mrb[45].mxu0  ;;  %v3215_v23 = vpop.f32.mrb[37].mxu1  ;;  %v2636_v59 = vadd.f32 %v2635_v12, %v3879_v8 }
 0x892   :  { %v2597_v57 = vadd.f32 %v2596_v18, %v3873_v43  ;;  %v2598_v11 = vpop.f32.mrb[46].mxu0  ;;  %v2638_v5 = vpop.f32.mrb[38].mxu1 }
 0x893   :  { %v2645_v22 = vadd.f32 %v2595_v19, %v3867_v21  ;;  %v2599_v9 = vpop.f32.mrb[47].mxu0  ;;  %v3216_v26 = vpop.f32.mrb[39].mxu1 }
 0x894   :  { %v2652_v31 = vadd.f32 %v2597_v57, %v3869_v35 }
 0x895   :  { %v2947_v30 = vmul.f32 -1.442695, %v2645_v22 }
 0x896   :  { %v2948_v46 = vmul.f32 -1.442695, %v2652_v31 }
 0x897   :  { %3448 = vpow2.f32 %v2947_v30 }
 0x898   :  { %3450 = vpow2.f32 %v2948_v46 }
 0x8a1   :  { %v3449_v55 = vpop.eup %3448 }
 0x8a2   :  { %v2649_v34 = vadd.f32 1.0, %v3449_v55  ;;  %v3451_v39 = vpop.eup %3450 }
 0x8a3   :  { %v2656_v47 = vadd.f32 1.0, %v3451_v39 }
 0x8a4   :  { %3452 = vrcp.f32 %v2649_v34 }
 0x8a5   :  { %3454 = vrcp.f32 %v2656_v47 }
 0x8ae   :  { %v3453_v43 = vpop.eup %3452 }
 0x8af   :  { %v2659_v52 = vmul.f32 %v3453_v43, %v2636_v59  ;;  %v3455_v3 = vpop.eup %3454 }
 0x8b0   :  { %v2662_v2 = vsub.f32 1.0, %v3455_v3  ;;  %v2664_v0 = vmul.f32 %v3455_v3, %v2390_v51 }
 0x8b1   :  { %v2660_v21 = vadd.f32 %v2659_v52, %v4199_v36 }
 0x8b3   :  { %3456 = vtanh.f32 %v2660_v21 }
 0x8bd   :  { %v3457_v35 = vpop.eup %3456 }
 0x8be   :  { %v2663_v1 = vmul.f32 %v3457_v35, %v2662_v2 }
 0x8c0   :  { %v2665_v24 = vadd.f32 %v2664_v0, %v2663_v1 }
 0x8c2   :  { %v2672_v14 = vpack.c.bf16 %v2665_v24, %v2665_v24  ;;  %2679 = vst [vmem:[#allocation13] sm:$0xff] %v2665_v24 }
 0x8c3   :  { %3557 = shalt.err (!%p3554_p8)
}
 0x8c4   :  { %s3558_s0 = scalar_lea.hbm %s4189_s7, 128 }
 0x8c5   :  { %p3559_p9 = scmp.ne.s32.totalorder %s4189_s7, %s3558_s0  ;;  %p3562_p10 = scmp.lt.u32.totalorder %s3558_s0, %s4189_s7 }
 0x8c7   :  { %p3564_p11 = pnand %p3562_p10, %p3559_p9 }
 0x8c9   :  { %3567 = shalt.err (!%p3564_p11)
}
 0x8ca   :  { %2701 = dma.vmem_to_hbm [thread:$0]  %s2699_s8, 128, %s4189_s7, [#allocation14]   ;;  %2674 = vst [vmem:[#allocation12 + $0x1c] sm:$0xf] %v2672_v14 }
 0x8cb   :  { %s3568_s19 = scalar_lea.vmem %s4148_s10, 512  ;;  %p3573_p13 = scmp.lt.s32.totalorder %s4148_s10, %s4148_s10 }
 0x8cc   :  { %p3569_p12 = scmp.ne.s32.totalorder %s4148_s10, %s3568_s19  ;;  %p3574_p0 = scmp.lt.s32.totalorder %s3568_s19, %s3568_s19 }
 0x8ce   :  { %p3575_p1 = por %p3574_p0, %p3573_p13 }
 0x8d0   :  { %p3576_p2 = pnand %p3575_p1, %p3569_p12 }
 0x8d2   :  { %3579 = shalt.err (!%p3576_p2)
}
 0x8d3   :  { %s3580_s22 = scalar_lea.hbm %s4188_s6, 512 }
 0x8d4   :  { %p3581_p3 = scmp.ne.s32.totalorder %s4188_s6, %s3580_s22  ;;  %p3584_p4 = scmp.lt.u32.totalorder %s3580_s22, %s4188_s6 }
 0x8d6   :  { %p3586_p5 = pnand %p3584_p4, %p3581_p3 }
 0x8d8   :  { %3589 = shalt.err (!%p3586_p5)
}
 0x8d9   :  { %2691 = dma.vmem_to_hbm [thread:$0]  %s4148_s10, 512, %s4188_s6, [#allocation6], %s3602_s1, %s3602_s1, %s3603_s23  }
 0x8da   :  { %3596 = dma.done.wait [#allocation6], 512  }
 0x8db   :  { %3597 = vsyncadd [#allocation6], 4294966784 }
 0x8dc   :  { %3598 = dma.done.wait [#allocation14], 128  }
 0x8dd   :  { %3599 = vsyncadd [#allocation14], 4294967168 }
 0x8de   :  { %2708 = vsyncpa [#allocation5], 1 }
 0x8df   :  { %2709 = vsyncpa [#allocation8], 1 }
 0x8e0   :  { %2710 = vsyncpa [#allocation11], 1 }
 0x8e1   :  { %2711 = vsyncpa [#allocation6], 1 }
 0x8e2   :  { %2712 = vsyncpa [#allocation14], 1 }

</bundles_post_ra>
